<compile_context>
chip_gen: v6e
topology: v6e:2x2x1
jax: 0.10.0
libtpu: 0.0.40
codegen_flags: <defaults>
</compile_context>

<pallas_src>
import functools
import math

import jax
import jax.numpy as jnp
from jax.experimental import pallas as pl
from jax.experimental.pallas import tpu as pltpu


def _round_up(x, m):
    return ((x + m - 1) // m) * m


@functools.lru_cache(maxsize=None)
def _vmem_limit_bytes():
    """Generation-aware scoped-VMEM budget (v5e/v6e: ~96 MiB, v7x: 48 MiB)."""
    cap = None
    try:
        cap = getattr(pltpu.get_tpu_info(), "vmem_capacity_bytes", None)
    except Exception:
        cap = None
    if not cap:
        cap = 64 * 1024 * 1024          # conservative fallback (v7x physical size)
    return int(min(cap * 3 // 4, 100 * 1024 * 1024))


def _pick_seq_tile(batch, seq):
    """Tile along the independent token axis (torch 'batch' == S)."""
    target_tokens = 1024 if _vmem_limit_bytes() >= 80 * 1024 * 1024 else 512
    per = max(8, (target_tokens // max(batch, 1)) // 8 * 8)
    return min(per, _round_up(seq, 8))


# ----------------------------------------------------------------------------
# Per-layer TransformerEncoderLayer kernel (norm_first=False, activation=relu)
# Block view: x_ref is (N, L, H), N = tile of independent rows (torch "batch"
# == S tile), L = attention axis (torch "seq" == python batch B).
# ----------------------------------------------------------------------------
def encoder_block_kernel(x_ref, g_ref, gt_ref, wqkv_ref, bqkv_ref, wo_ref, bo_ref,
                         ln1w_ref, ln1b_ref, w1_ref, b1_ref, w2_ref, b2_ref,
                         ln2w_ref, ln2b_ref, o_ref, *, num_heads):
    x = x_ref[...]                                   # (N, L, H) f32
    N, L, H = x.shape
    NL = N * L
    dh = H // num_heads
    eps = 1e-5
    scale = 1.0 / math.sqrt(dh)

    x2d = x.reshape(NL, H)

    # --- QKV projection (bf16 MXU inputs, f32 accumulation) -------------------
    qkv = jnp.dot(x2d.astype(jnp.bfloat16), wqkv_ref[...],
                  preferred_element_type=jnp.float32) + bqkv_ref[...]   # (NL, 3H)
    q = qkv[:, 0:H].reshape(N, L, H)
    k = qkv[:, H:2 * H].reshape(N, L, H)
    v = qkv[:, 2 * H:3 * H].reshape(N, L, H)

    # --- multi-head attention over the L axis ---------------------------------
    # Per (token n, head h) there is an LxL attention.  L is the python batch
    # (small), so unroll over the key index m.  Head-wise d-reduction and
    # head->H expansion are 2D MXU dots against 0/1 indicator matrices; no
    # transposes, no multi-batch dot_generals.
    # TODO(synk): this unroll assumes a small attention axis (== batch); for a
    # large batch a fori_loop / grid formulation would be needed.
    g = g_ref[...]                                   # (H, nh) bf16
    gt = gt_ref[...]                                 # (nh, H) bf16
    s_cols = []
    for m in range(L):
        prod = (q * k[:, m:m + 1, :]).reshape(NL, H).astype(jnp.bfloat16)
        s_cols.append(jnp.dot(prod, g, preferred_element_type=jnp.float32) * scale)
    s_max = s_cols[0]
    for c in s_cols[1:]:
        s_max = jnp.maximum(s_max, c)
    e_cols = [jnp.exp(c - s_max) for c in s_cols]
    denom = e_cols[0]
    for c in e_cols[1:]:
        denom = denom + c
    inv = pl.reciprocal(denom, approx=True)          # (NL, nh)

    ctx = jnp.zeros((N, L, H), jnp.float32)
    for m in range(L):
        p_m = (e_cols[m] * inv).astype(jnp.bfloat16)                     # (NL, nh)
        w_m = jnp.dot(p_m, gt, preferred_element_type=jnp.float32)       # (NL, H)
        ctx = ctx + w_m.reshape(N, L, H) * v[:, m:m + 1, :]
    ctx2d = ctx.reshape(NL, H)

    attn = jnp.dot(ctx2d.astype(jnp.bfloat16), wo_ref[...],
                   preferred_element_type=jnp.float32) + bo_ref[...]

    # --- residual + LayerNorm 1 (f32; dropout1 is eval identity) --------------
    y = x2d + attn
    mu = jnp.mean(y, axis=-1, keepdims=True)
    var = jnp.mean(jnp.square(y - mu), axis=-1, keepdims=True)
    y = (y - mu) * jax.lax.rsqrt(var + eps) * ln1w_ref[...] + ln1b_ref[...]

    # --- feed-forward (ReLU), bf16 matmuls / f32 accumulate --------------------
    h1 = jnp.dot(y.astype(jnp.bfloat16), w1_ref[...],
                 preferred_element_type=jnp.float32) + b1_ref[...]
    h1 = jnp.maximum(h1, 0.0)
    ff = jnp.dot(h1.astype(jnp.bfloat16), w2_ref[...],
                 preferred_element_type=jnp.float32) + b2_ref[...]

    # --- residual + LayerNorm 2 (f32; dropout2 is eval identity) --------------
    z = y + ff
    mu2 = jnp.mean(z, axis=-1, keepdims=True)
    var2 = jnp.mean(jnp.square(z - mu2), axis=-1, keepdims=True)
    z = (z - mu2) * jax.lax.rsqrt(var2 + eps) * ln2w_ref[...] + ln2b_ref[...]

    o_ref[...] = z.reshape(N, L, H)


def encoder_block(x, g, gt, p, num_heads, *, seq_tile):
    """x: (S_pad, B, H) f32.  Grid over S tiles; weights resident in VMEM."""
    S_pad, B, H = x.shape
    grid = (S_pad // seq_tile,)
    row_spec = pl.BlockSpec((seq_tile, B, H), lambda i: (i, 0, 0))
    # Whole-array, single-buffered VMEM residency (fetched once per call; not
    # double-buffered, so the bf16 weights fit comfortably on v7x's 64 MiB VMEM).
    res_spec = pl.BlockSpec(memory_space=pltpu.MemorySpace.VMEM)
    args = (x, g, gt,
            p['wqkv_t'], p['bqkv'], p['wo_t'], p['bo'],
            p['ln1_w'], p['ln1_b'],
            p['w1_t'], p['b1'], p['w2_t'], p['b2'],
            p['ln2_w'], p['ln2_b'])
    return pl.pallas_call(
        functools.partial(encoder_block_kernel, num_heads=num_heads),
        out_shape=jax.ShapeDtypeStruct(x.shape, jnp.float32),
        grid=grid,
        in_specs=[row_spec] + [res_spec] * (len(args) - 1),
        out_specs=row_spec,
        compiler_params=pltpu.CompilerParams(
            dimension_semantics=("parallel",),
            vmem_limit_bytes=_vmem_limit_bytes()),
    )(*args)


# ----------------------------------------------------------------------------
# lm_head: (T, H) bf16 @ (H, V) bf16 + b, tiled over rows and vocab.
# Vocab axis is the OUTER ("parallel") grid axis so each (H, v_tile) weight slab
# is DMA'd once; the row axis is the inner "arbitrary" (sequential) axis.
# ----------------------------------------------------------------------------
def lm_head_kernel(x_ref, w_ref, b_ref, o_ref):
    o_ref[...] = (jnp.dot(x_ref[...], w_ref[...],
                          preferred_element_type=jnp.float32) + b_ref[...])


def lm_head(x2d_bf16, w_t, b2d, *, t_tile_target=512, v_tile_target=4096):
    T, H = x2d_bf16.shape
    V = w_t.shape[1]
    t_tile = min(t_tile_target, _round_up(T, 8))
    v_tile = min(v_tile_target, _round_up(V, 128))
    grid = (pl.cdiv(V, v_tile), pl.cdiv(T, t_tile))   # vocab outer, rows inner
    return pl.pallas_call(
        lm_head_kernel,
        out_shape=jax.ShapeDtypeStruct((T, V), jnp.float32),
        grid=grid,
        in_specs=[
            pl.BlockSpec((t_tile, H), lambda j, i: (i, 0)),
            pl.BlockSpec((H, v_tile), lambda j, i: (0, j)),
            pl.BlockSpec((1, v_tile), lambda j, i: (0, j)),
        ],
        out_specs=pl.BlockSpec((t_tile, v_tile), lambda j, i: (i, j)),
        compiler_params=pltpu.CompilerParams(
            dimension_semantics=("parallel", "arbitrary"),
            vmem_limit_bytes=_vmem_limit_bytes()),
    )(x2d_bf16, w_t, b2d)


# ----------------------------------------------------------------------------
# Full model forward
# ----------------------------------------------------------------------------
def _head_indicator_matrices(hidden, num_heads):
    dh = hidden // num_heads
    head_of_col = jnp.arange(hidden) // dh                       # (H,)
    g = (head_of_col[:, None] == jnp.arange(num_heads)[None, :]).astype(jnp.bfloat16)
    return g, jnp.transpose(g)                                   # (H, nh), (nh, H)


def gpt3_like_forward(input_ids, params, num_heads):
    B, S = input_ids.shape
    # Embedding gather (plain-JAX glue); keep activations as (S, B, H).
    x = jnp.take(params['emb'], jnp.transpose(input_ids), axis=0)   # (S, B, H) f32
    H = x.shape[-1]

    tile_s = _pick_seq_tile(B, S)
    S_pad = _round_up(S, tile_s)
    if S_pad != S:
        x = jnp.pad(x, ((0, S_pad - S), (0, 0), (0, 0)))

    g, gt = _head_indicator_matrices(H, num_heads)

    # TODO(synk): next-layer weight prefetch is not overlapped with the current
    # layer's compute (would need a stacked-layer grid axis or cross-call DMA
    # futures); ~11 MiB/layer of exposed DMA at real sizes.
    for layer_params in params['layers']:
        x = encoder_block(x, g, gt, layer_params, num_heads, seq_tile=tile_s)

    x = x[:S]                                                    # (S, B, H)
    # Stream the lm_head activation in bf16 (it is re-read once per vocab slab).
    logits = lm_head(x.reshape(S * B, H).astype(jnp.bfloat16),
                     params['lm_w_t'], params['lm_b'])           # (S*B, V) f32
    V = logits.shape[-1]
    return jnp.transpose(logits.reshape(S, B, V), (1, 0, 2))     # (B, S, V)


# ----------------------------------------------------------------------------
# Deterministic parameter initialization (shapes follow the nn.Module __init__).
# Matmul weights stored in bf16 (halves VMEM residency & HBM traffic, f32 acc);
# biases / LayerNorm params / embedding stay f32.
# ----------------------------------------------------------------------------
def init_params(key, vocab_size, hidden, ffn, num_layers):
    keys = jax.random.split(key, 2 + 6 * num_layers)
    ki = iter(keys)

    def rnd(k, shape, dtype=jnp.float32):
        return (jax.random.normal(k, shape, jnp.float32) * 0.02).astype(dtype)

    params = {
        'emb': rnd(next(ki), (vocab_size, hidden)),
        'layers': [],
        # nn.Linear(hidden, vocab): weight (V, H) -> stored transposed (H, V)
        'lm_w_t': rnd(next(ki), (hidden, vocab_size), jnp.bfloat16),
        'lm_b': jnp.zeros((1, vocab_size), jnp.float32),
    }
    for _ in range(num_layers):
        layer = {
            # MultiheadAttention in_proj_weight (3H, H) -> transposed (H, 3H)
            'wqkv_t': rnd(next(ki), (hidden, 3 * hidden), jnp.bfloat16),
            'bqkv': rnd(next(ki), (1, 3 * hidden)),
            # out_proj (H, H) -> transposed (H, H)
            'wo_t': rnd(next(ki), (hidden, hidden), jnp.bfloat16),
            'bo': jnp.zeros((1, hidden), jnp.float32),
            'ln1_w': jnp.ones((1, hidden), jnp.float32),
            'ln1_b': jnp.zeros((1, hidden), jnp.float32),
            # linear1 (F, H) -> (H, F); linear2 (H, F) -> (F, H)
            'w1_t': rnd(next(ki), (hidden, ffn), jnp.bfloat16),
            'b1': jnp.zeros((1, ffn), jnp.float32),
            'w2_t': rnd(next(ki), (ffn, hidden), jnp.bfloat16),
            'b2': jnp.zeros((1, hidden), jnp.float32),
            'ln2_w': jnp.ones((1, hidden), jnp.float32),
            'ln2_b': jnp.zeros((1, hidden), jnp.float32),
        }
        params['layers'].append(layer)
    return params


if __name__ == "__main__":
    # Small synthetic config consistent with the module's structure.
    VOCAB = 256        # stands in for tokenizer.vocab_size
    HIDDEN = 32        # stands in for 768
    NUM_HEADS = 4      # stands in for 12
    NUM_LAYERS = 2     # stands in for 12
    FFN = 64           # stands in for the default dim_feedforward=2048
    BATCH, SEQ = 2, 8

    root = jax.random.PRNGKey(0)
    k_params, k_ids = jax.random.split(root)
    params = init_params(k_params, VOCAB, HIDDEN, FFN, NUM_LAYERS)
    input_ids = jax.random.randint(k_ids, (BATCH, SEQ), 0, VOCAB, dtype=jnp.int32)

    fwd = jax.jit(functools.partial(gpt3_like_forward, num_heads=NUM_HEADS))
    logits = fwd(input_ids, params)
    jax.block_until_ready(logits)

    assert logits.shape == (BATCH, SEQ, VOCAB), logits.shape
    assert bool(jnp.all(jnp.isfinite(logits)))
    # TODO(synk): dropout layers (p=0.1) inside TransformerEncoderLayer are
    # treated as eval-mode identities (no RNG-matched training dropout).
    # TODO(synk): faithful to the reference, attention mixes over the batch axis
    # (batch_first=False fed with (B,S,H)) and there is no causal mask.
    print("KERNEL_OK")
</pallas_src>

<mosaic_0001>
module attributes {stable_mosaic.version = 11 : i64} {
  func.func @encoder_block_kernel(%arg0: i32, %arg1: memref<8x2x32xf32, #tpu.memory_space<vmem>>, %arg2: memref<32x4xbf16, #tpu.memory_space<vmem>>, %arg3: memref<4x32xbf16, #tpu.memory_space<vmem>>, %arg4: memref<32x96xbf16, #tpu.memory_space<vmem>>, %arg5: memref<1x96xf32, #tpu.memory_space<vmem>>, %arg6: memref<32x32xbf16, #tpu.memory_space<vmem>>, %arg7: memref<1x32xf32, #tpu.memory_space<vmem>>, %arg8: memref<1x32xf32, #tpu.memory_space<vmem>>, %arg9: memref<1x32xf32, #tpu.memory_space<vmem>>, %arg10: memref<32x64xbf16, #tpu.memory_space<vmem>>, %arg11: memref<1x64xf32, #tpu.memory_space<vmem>>, %arg12: memref<64x32xbf16, #tpu.memory_space<vmem>>, %arg13: memref<1x32xf32, #tpu.memory_space<vmem>>, %arg14: memref<1x32xf32, #tpu.memory_space<vmem>>, %arg15: memref<1x32xf32, #tpu.memory_space<vmem>>, %arg16: memref<8x2x32xf32, #tpu.memory_space<vmem>>) attributes {dimension_semantics = [#tpu.dimension_semantics<parallel>], iteration_bounds = array<i64: 1>, scalar_prefetch = 0 : i64, scratch_operands = 0 : i64, tpu.core_type = #tpu.core_type<tc>, window_params = [{transform_indices = @transform_0, window_bounds = array<i64: 8, 2, 32>}, {pipeline_mode = #tpu.pipeline_mode<synchronous>, transform_indices = @transform_1, window_bounds = array<i64: 32, 4>}, {pipeline_mode = #tpu.pipeline_mode<synchronous>, transform_indices = @transform_2, window_bounds = array<i64: 4, 32>}, {pipeline_mode = #tpu.pipeline_mode<synchronous>, transform_indices = @transform_3, window_bounds = array<i64: 32, 96>}, {pipeline_mode = #tpu.pipeline_mode<synchronous>, transform_indices = @transform_4, window_bounds = array<i64: 1, 96>}, {pipeline_mode = #tpu.pipeline_mode<synchronous>, transform_indices = @transform_5, window_bounds = array<i64: 32, 32>}, {pipeline_mode = #tpu.pipeline_mode<synchronous>, transform_indices = @transform_6, window_bounds = array<i64: 1, 32>}, {pipeline_mode = #tpu.pipeline_mode<synchronous>, transform_indices = @transform_7, window_bounds = array<i64: 1, 32>}, {pipeline_mode = #tpu.pipeline_mode<synchronous>, transform_indices = @transform_8, window_bounds = array<i64: 1, 32>}, {pipeline_mode = #tpu.pipeline_mode<synchronous>, transform_indices = @transform_9, window_bounds = array<i64: 32, 64>}, {pipeline_mode = #tpu.pipeline_mode<synchronous>, transform_indices = @transform_10, window_bounds = array<i64: 1, 64>}, {pipeline_mode = #tpu.pipeline_mode<synchronous>, transform_indices = @transform_11, window_bounds = array<i64: 64, 32>}, {pipeline_mode = #tpu.pipeline_mode<synchronous>, transform_indices = @transform_12, window_bounds = array<i64: 1, 32>}, {pipeline_mode = #tpu.pipeline_mode<synchronous>, transform_indices = @transform_13, window_bounds = array<i64: 1, 32>}, {pipeline_mode = #tpu.pipeline_mode<synchronous>, transform_indices = @transform_14, window_bounds = array<i64: 1, 32>}, {transform_indices = @transform_15, window_bounds = array<i64: 8, 2, 32>}]} {
    %c0 = arith.constant 0 : index
    %c0_0 = arith.constant 0 : index
    %c0_1 = arith.constant 0 : index
    %0 = vector.load %arg1[%c0, %c0_0, %c0_1] : memref<8x2x32xf32, #tpu.memory_space<vmem>>, vector<8x2x32xf32>
    %1 = vector.shape_cast %0 : vector<8x2x32xf32> to vector<16x32xf32>
    %2 = arith.truncf %1 : vector<16x32xf32> to vector<16x32xbf16>
    %c0_2 = arith.constant 0 : index
    %c0_3 = arith.constant 0 : index
    %3 = vector.load %arg4[%c0_2, %c0_3] : memref<32x96xbf16, #tpu.memory_space<vmem>>, vector<32x96xbf16>
    %cst = arith.constant dense<0.000000e+00> : vector<16x96xf32>
    %4 = tpu.matmul %2, %3, %cst {dimension_numbers = #tpu.dot_dimension_numbers<[1], [0], [0], [1], [0, 0, 1, 1], [], []>} : vector<16x32xbf16>, vector<32x96xbf16>, vector<16x96xf32> -> vector<16x96xf32>
    %c0_4 = arith.constant 0 : index
    %c0_5 = arith.constant 0 : index
    %5 = vector.load %arg5[%c0_4, %c0_5] : memref<1x96xf32, #tpu.memory_space<vmem>>, vector<1x96xf32>
    %6 = vector.broadcast %5 : vector<1x96xf32> to vector<16x96xf32>
    %7 = arith.addf %4, %6 : vector<16x96xf32>
    %8 = vector.extract_strided_slice %7 {offsets = [0, 0], sizes = [16, 32], strides = [1, 1]} : vector<16x96xf32> to vector<16x32xf32>
    %9 = vector.shape_cast %8 : vector<16x32xf32> to vector<8x2x32xf32>
    %10 = vector.extract_strided_slice %7 {offsets = [0, 32], sizes = [16, 32], strides = [1, 1]} : vector<16x96xf32> to vector<16x32xf32>
    %11 = vector.shape_cast %10 : vector<16x32xf32> to vector<8x2x32xf32>
    %12 = vector.extract_strided_slice %7 {offsets = [0, 64], sizes = [16, 32], strides = [1, 1]} : vector<16x96xf32> to vector<16x32xf32>
    %13 = vector.shape_cast %12 : vector<16x32xf32> to vector<8x2x32xf32>
    %c0_6 = arith.constant 0 : index
    %c0_7 = arith.constant 0 : index
    %14 = vector.load %arg2[%c0_6, %c0_7] : memref<32x4xbf16, #tpu.memory_space<vmem>>, vector<32x4xbf16>
    %c0_8 = arith.constant 0 : index
    %c0_9 = arith.constant 0 : index
    %15 = vector.load %arg3[%c0_8, %c0_9] : memref<4x32xbf16, #tpu.memory_space<vmem>>, vector<4x32xbf16>
    %16 = vector.extract_strided_slice %11 {offsets = [0, 0, 0], sizes = [8, 1, 32], strides = [1, 1, 1]} : vector<8x2x32xf32> to vector<8x1x32xf32>
    %17 = vector.broadcast %16 : vector<8x1x32xf32> to vector<8x2x32xf32>
    %18 = arith.mulf %9, %17 : vector<8x2x32xf32>
    %19 = vector.shape_cast %18 : vector<8x2x32xf32> to vector<16x32xf32>
    %20 = arith.truncf %19 : vector<16x32xf32> to vector<16x32xbf16>
    %cst_10 = arith.constant dense<0.000000e+00> : vector<16x4xf32>
    %21 = tpu.matmul %20, %14, %cst_10 {dimension_numbers = #tpu.dot_dimension_numbers<[1], [0], [0], [1], [0, 0, 1, 1], [], []>} : vector<16x32xbf16>, vector<32x4xbf16>, vector<16x4xf32> -> vector<16x4xf32>
    %cst_11 = arith.constant 0.353553385 : f32
    %22 = vector.broadcast %cst_11 : f32 to vector<16x4xf32>
    %23 = arith.mulf %21, %22 : vector<16x4xf32>
    %24 = vector.extract_strided_slice %11 {offsets = [0, 1, 0], sizes = [8, 1, 32], strides = [1, 1, 1]} : vector<8x2x32xf32> to vector<8x1x32xf32>
    %25 = vector.broadcast %24 : vector<8x1x32xf32> to vector<8x2x32xf32>
    %26 = arith.mulf %9, %25 : vector<8x2x32xf32>
    %27 = vector.shape_cast %26 : vector<8x2x32xf32> to vector<16x32xf32>
    %28 = arith.truncf %27 : vector<16x32xf32> to vector<16x32xbf16>
    %cst_12 = arith.constant dense<0.000000e+00> : vector<16x4xf32>
    %29 = tpu.matmul %28, %14, %cst_12 {dimension_numbers = #tpu.dot_dimension_numbers<[1], [0], [0], [1], [0, 0, 1, 1], [], []>} : vector<16x32xbf16>, vector<32x4xbf16>, vector<16x4xf32> -> vector<16x4xf32>
    %cst_13 = arith.constant 0.353553385 : f32
    %30 = vector.broadcast %cst_13 : f32 to vector<16x4xf32>
    %31 = arith.mulf %29, %30 : vector<16x4xf32>
    %32 = arith.maximumf %23, %31 : vector<16x4xf32>
    %33 = arith.subf %23, %32 : vector<16x4xf32>
    %34 = math.exp %33 : vector<16x4xf32>
    %35 = arith.subf %31, %32 : vector<16x4xf32>
    %36 = math.exp %35 : vector<16x4xf32>
    %37 = arith.addf %34, %36 : vector<16x4xf32>
    %38 = tpu.reciprocal %37 {approx = true} : vector<16x4xf32> -> vector<16x4xf32>
    %cst_14 = arith.constant 0.000000e+00 : f32
    %39 = vector.broadcast %cst_14 : f32 to vector<8x2x32xf32>
    %40 = arith.mulf %34, %38 : vector<16x4xf32>
    %41 = arith.truncf %40 : vector<16x4xf32> to vector<16x4xbf16>
    %cst_15 = arith.constant dense<0.000000e+00> : vector<16x32xf32>
    %42 = tpu.matmul %41, %15, %cst_15 {dimension_numbers = #tpu.dot_dimension_numbers<[1], [0], [0], [1], [0, 0, 1, 1], [], []>} : vector<16x4xbf16>, vector<4x32xbf16>, vector<16x32xf32> -> vector<16x32xf32>
    %43 = vector.shape_cast %42 : vector<16x32xf32> to vector<8x2x32xf32>
    %44 = vector.extract_strided_slice %13 {offsets = [0, 0, 0], sizes = [8, 1, 32], strides = [1, 1, 1]} : vector<8x2x32xf32> to vector<8x1x32xf32>
    %45 = vector.broadcast %44 : vector<8x1x32xf32> to vector<8x2x32xf32>
    %46 = arith.mulf %43, %45 : vector<8x2x32xf32>
    %47 = arith.addf %39, %46 : vector<8x2x32xf32>
    %48 = arith.mulf %36, %38 : vector<16x4xf32>
    %49 = arith.truncf %48 : vector<16x4xf32> to vector<16x4xbf16>
    %cst_16 = arith.constant dense<0.000000e+00> : vector<16x32xf32>
    %50 = tpu.matmul %49, %15, %cst_16 {dimension_numbers = #tpu.dot_dimension_numbers<[1], [0], [0], [1], [0, 0, 1, 1], [], []>} : vector<16x4xbf16>, vector<4x32xbf16>, vector<16x32xf32> -> vector<16x32xf32>
    %51 = vector.shape_cast %50 : vector<16x32xf32> to vector<8x2x32xf32>
    %52 = vector.extract_strided_slice %13 {offsets = [0, 1, 0], sizes = [8, 1, 32], strides = [1, 1, 1]} : vector<8x2x32xf32> to vector<8x1x32xf32>
    %53 = vector.broadcast %52 : vector<8x1x32xf32> to vector<8x2x32xf32>
    %54 = arith.mulf %51, %53 : vector<8x2x32xf32>
    %55 = arith.addf %47, %54 : vector<8x2x32xf32>
    %56 = vector.shape_cast %55 : vector<8x2x32xf32> to vector<16x32xf32>
    %57 = arith.truncf %56 : vector<16x32xf32> to vector<16x32xbf16>
    %c0_17 = arith.constant 0 : index
    %c0_18 = arith.constant 0 : index
    %58 = vector.load %arg6[%c0_17, %c0_18] : memref<32x32xbf16, #tpu.memory_space<vmem>>, vector<32x32xbf16>
    %cst_19 = arith.constant dense<0.000000e+00> : vector<16x32xf32>
    %59 = tpu.matmul %57, %58, %cst_19 {dimension_numbers = #tpu.dot_dimension_numbers<[1], [0], [0], [1], [0, 0, 1, 1], [], []>} : vector<16x32xbf16>, vector<32x32xbf16>, vector<16x32xf32> -> vector<16x32xf32>
    %c0_20 = arith.constant 0 : index
    %c0_21 = arith.constant 0 : index
    %60 = vector.load %arg7[%c0_20, %c0_21] : memref<1x32xf32, #tpu.memory_space<vmem>>, vector<1x32xf32>
    %61 = vector.broadcast %60 : vector<1x32xf32> to vector<16x32xf32>
    %62 = arith.addf %59, %61 : vector<16x32xf32>
    %63 = arith.addf %1, %62 : vector<16x32xf32>
    %cst_22 = arith.constant dense<0.000000e+00> : vector<16xf32>
    %64 = vector.multi_reduction <add>, %63, %cst_22 [1] : vector<16x32xf32> to vector<16xf32>
    %65 = vector.shape_cast %64 : vector<16xf32> to vector<16x1xf32>
    %cst_23 = arith.constant 3.200000e+01 : f32
    %66 = vector.broadcast %cst_23 : f32 to vector<16x1xf32>
    %67 = arith.divf %65, %66 : vector<16x1xf32>
    %68 = vector.broadcast %67 : vector<16x1xf32> to vector<16x32xf32>
    %69 = arith.subf %63, %68 : vector<16x32xf32>
    %70 = arith.mulf %69, %69 : vector<16x32xf32>
    %cst_24 = arith.constant dense<0.000000e+00> : vector<16xf32>
    %71 = vector.multi_reduction <add>, %70, %cst_24 [1] : vector<16x32xf32> to vector<16xf32>
    %72 = vector.shape_cast %71 : vector<16xf32> to vector<16x1xf32>
    %cst_25 = arith.constant 3.200000e+01 : f32
    %73 = vector.broadcast %cst_25 : f32 to vector<16x1xf32>
    %74 = arith.divf %72, %73 : vector<16x1xf32>
    %75 = vector.broadcast %67 : vector<16x1xf32> to vector<16x32xf32>
    %76 = arith.subf %63, %75 : vector<16x32xf32>
    %cst_26 = arith.constant 9.99999974E-6 : f32
    %77 = vector.broadcast %cst_26 : f32 to vector<16x1xf32>
    %78 = arith.addf %74, %77 : vector<16x1xf32>
    %79 = math.rsqrt %78 : vector<16x1xf32>
    %80 = vector.broadcast %79 : vector<16x1xf32> to vector<16x32xf32>
    %81 = arith.mulf %76, %80 : vector<16x32xf32>
    %c0_27 = arith.constant 0 : index
    %c0_28 = arith.constant 0 : index
    %82 = vector.load %arg8[%c0_27, %c0_28] : memref<1x32xf32, #tpu.memory_space<vmem>>, vector<1x32xf32>
    %83 = vector.broadcast %82 : vector<1x32xf32> to vector<16x32xf32>
    %84 = arith.mulf %81, %83 : vector<16x32xf32>
    %c0_29 = arith.constant 0 : index
    %c0_30 = arith.constant 0 : index
    %85 = vector.load %arg9[%c0_29, %c0_30] : memref<1x32xf32, #tpu.memory_space<vmem>>, vector<1x32xf32>
    %86 = vector.broadcast %85 : vector<1x32xf32> to vector<16x32xf32>
    %87 = arith.addf %84, %86 : vector<16x32xf32>
    %88 = arith.truncf %87 : vector<16x32xf32> to vector<16x32xbf16>
    %c0_31 = arith.constant 0 : index
    %c0_32 = arith.constant 0 : index
    %89 = vector.load %arg10[%c0_31, %c0_32] : memref<32x64xbf16, #tpu.memory_space<vmem>>, vector<32x64xbf16>
    %cst_33 = arith.constant dense<0.000000e+00> : vector<16x64xf32>
    %90 = tpu.matmul %88, %89, %cst_33 {dimension_numbers = #tpu.dot_dimension_numbers<[1], [0], [0], [1], [0, 0, 1, 1], [], []>} : vector<16x32xbf16>, vector<32x64xbf16>, vector<16x64xf32> -> vector<16x64xf32>
    %c0_34 = arith.constant 0 : index
    %c0_35 = arith.constant 0 : index
    %91 = vector.load %arg11[%c0_34, %c0_35] : memref<1x64xf32, #tpu.memory_space<vmem>>, vector<1x64xf32>
    %92 = vector.broadcast %91 : vector<1x64xf32> to vector<16x64xf32>
    %93 = arith.addf %90, %92 : vector<16x64xf32>
    %cst_36 = arith.constant 0.000000e+00 : f32
    %94 = vector.broadcast %cst_36 : f32 to vector<16x64xf32>
    %95 = arith.maximumf %93, %94 : vector<16x64xf32>
    %96 = arith.truncf %95 : vector<16x64xf32> to vector<16x64xbf16>
    %c0_37 = arith.constant 0 : index
    %c0_38 = arith.constant 0 : index
    %97 = vector.load %arg12[%c0_37, %c0_38] : memref<64x32xbf16, #tpu.memory_space<vmem>>, vector<64x32xbf16>
    %cst_39 = arith.constant dense<0.000000e+00> : vector<16x32xf32>
    %98 = tpu.matmul %96, %97, %cst_39 {dimension_numbers = #tpu.dot_dimension_numbers<[1], [0], [0], [1], [0, 0, 1, 1], [], []>} : vector<16x64xbf16>, vector<64x32xbf16>, vector<16x32xf32> -> vector<16x32xf32>
    %c0_40 = arith.constant 0 : index
    %c0_41 = arith.constant 0 : index
    %99 = vector.load %arg13[%c0_40, %c0_41] : memref<1x32xf32, #tpu.memory_space<vmem>>, vector<1x32xf32>
    %100 = vector.broadcast %99 : vector<1x32xf32> to vector<16x32xf32>
    %101 = arith.addf %98, %100 : vector<16x32xf32>
    %102 = arith.addf %87, %101 : vector<16x32xf32>
    %cst_42 = arith.constant dense<0.000000e+00> : vector<16xf32>
    %103 = vector.multi_reduction <add>, %102, %cst_42 [1] : vector<16x32xf32> to vector<16xf32>
    %104 = vector.shape_cast %103 : vector<16xf32> to vector<16x1xf32>
    %cst_43 = arith.constant 3.200000e+01 : f32
    %105 = vector.broadcast %cst_43 : f32 to vector<16x1xf32>
    %106 = arith.divf %104, %105 : vector<16x1xf32>
    %107 = vector.broadcast %106 : vector<16x1xf32> to vector<16x32xf32>
    %108 = arith.subf %102, %107 : vector<16x32xf32>
    %109 = arith.mulf %108, %108 : vector<16x32xf32>
    %cst_44 = arith.constant dense<0.000000e+00> : vector<16xf32>
    %110 = vector.multi_reduction <add>, %109, %cst_44 [1] : vector<16x32xf32> to vector<16xf32>
    %111 = vector.shape_cast %110 : vector<16xf32> to vector<16x1xf32>
    %cst_45 = arith.constant 3.200000e+01 : f32
    %112 = vector.broadcast %cst_45 : f32 to vector<16x1xf32>
    %113 = arith.divf %111, %112 : vector<16x1xf32>
    %114 = vector.broadcast %106 : vector<16x1xf32> to vector<16x32xf32>
    %115 = arith.subf %102, %114 : vector<16x32xf32>
    %cst_46 = arith.constant 9.99999974E-6 : f32
    %116 = vector.broadcast %cst_46 : f32 to vector<16x1xf32>
    %117 = arith.addf %113, %116 : vector<16x1xf32>
    %118 = math.rsqrt %117 : vector<16x1xf32>
    %119 = vector.broadcast %118 : vector<16x1xf32> to vector<16x32xf32>
    %120 = arith.mulf %115, %119 : vector<16x32xf32>
    %c0_47 = arith.constant 0 : index
    %c0_48 = arith.constant 0 : index
    %121 = vector.load %arg14[%c0_47, %c0_48] : memref<1x32xf32, #tpu.memory_space<vmem>>, vector<1x32xf32>
    %122 = vector.broadcast %121 : vector<1x32xf32> to vector<16x32xf32>
    %123 = arith.mulf %120, %122 : vector<16x32xf32>
    %c0_49 = arith.constant 0 : index
    %c0_50 = arith.constant 0 : index
    %124 = vector.load %arg15[%c0_49, %c0_50] : memref<1x32xf32, #tpu.memory_space<vmem>>, vector<1x32xf32>
    %125 = vector.broadcast %124 : vector<1x32xf32> to vector<16x32xf32>
    %126 = arith.addf %123, %125 : vector<16x32xf32>
    %127 = vector.shape_cast %126 : vector<16x32xf32> to vector<8x2x32xf32>
    %c0_51 = arith.constant 0 : index
    %c0_52 = arith.constant 0 : index
    %c0_53 = arith.constant 0 : index
    %128 = vector.load %arg16[%c0_51, %c0_52, %c0_53] : memref<8x2x32xf32, #tpu.memory_space<vmem>>, vector<8x2x32xf32>
    tpu.vector_store %arg16[%c0_51, %c0_52, %c0_53], %127 {strides = array<i32>} : memref<8x2x32xf32, #tpu.memory_space<vmem>>, vector<8x2x32xf32>,
    return
  }
  func.func @transform_0(%arg0: i32) -> (i32, i32, i32) {
    %c0_i32 = arith.constant 0 : i32
    %c0_i32_0 = arith.constant 0 : i32
    %c0_i32_1 = arith.constant 0 : i32
    return %arg0, %c0_i32, %c0_i32_0 : i32, i32, i32
  }
  func.func @transform_1(%arg0: i32) -> (i32, i32) {
    %c0_i32 = arith.constant 0 : i32
    %c0_i32_0 = arith.constant 0 : i32
    %c0_i32_1 = arith.constant 0 : i32
    return %c0_i32, %c0_i32_0 : i32, i32
  }
  func.func @transform_2(%arg0: i32) -> (i32, i32) {
    %c0_i32 = arith.constant 0 : i32
    %c0_i32_0 = arith.constant 0 : i32
    %c0_i32_1 = arith.constant 0 : i32
    return %c0_i32, %c0_i32_0 : i32, i32
  }
  func.func @transform_3(%arg0: i32) -> (i32, i32) {
    %c0_i32 = arith.constant 0 : i32
    %c0_i32_0 = arith.constant 0 : i32
    %c0_i32_1 = arith.constant 0 : i32
    return %c0_i32, %c0_i32_0 : i32, i32
  }
  func.func @transform_4(%arg0: i32) -> (i32, i32) {
    %c0_i32 = arith.constant 0 : i32
    %c0_i32_0 = arith.constant 0 : i32
    %c0_i32_1 = arith.constant 0 : i32
    return %c0_i32, %c0_i32_0 : i32, i32
  }
  func.func @transform_5(%arg0: i32) -> (i32, i32) {
    %c0_i32 = arith.constant 0 : i32
    %c0_i32_0 = arith.constant 0 : i32
    %c0_i32_1 = arith.constant 0 : i32
    return %c0_i32, %c0_i32_0 : i32, i32
  }
  func.func @transform_6(%arg0: i32) -> (i32, i32) {
    %c0_i32 = arith.constant 0 : i32
    %c0_i32_0 = arith.constant 0 : i32
    %c0_i32_1 = arith.constant 0 : i32
    return %c0_i32, %c0_i32_0 : i32, i32
  }
  func.func @transform_7(%arg0: i32) -> (i32, i32) {
    %c0_i32 = arith.constant 0 : i32
    %c0_i32_0 = arith.constant 0 : i32
    %c0_i32_1 = arith.constant 0 : i32
    return %c0_i32, %c0_i32_0 : i32, i32
  }
  func.func @transform_8(%arg0: i32) -> (i32, i32) {
    %c0_i32 = arith.constant 0 : i32
    %c0_i32_0 = arith.constant 0 : i32
    %c0_i32_1 = arith.constant 0 : i32
    return %c0_i32, %c0_i32_0 : i32, i32
  }
  func.func @transform_9(%arg0: i32) -> (i32, i32) {
    %c0_i32 = arith.constant 0 : i32
    %c0_i32_0 = arith.constant 0 : i32
    %c0_i32_1 = arith.constant 0 : i32
    return %c0_i32, %c0_i32_0 : i32, i32
  }
  func.func @transform_10(%arg0: i32) -> (i32, i32) {
    %c0_i32 = arith.constant 0 : i32
    %c0_i32_0 = arith.constant 0 : i32
    %c0_i32_1 = arith.constant 0 : i32
    return %c0_i32, %c0_i32_0 : i32, i32
  }
  func.func @transform_11(%arg0: i32) -> (i32, i32) {
    %c0_i32 = arith.constant 0 : i32
    %c0_i32_0 = arith.constant 0 : i32
    %c0_i32_1 = arith.constant 0 : i32
    return %c0_i32, %c0_i32_0 : i32, i32
  }
  func.func @transform_12(%arg0: i32) -> (i32, i32) {
    %c0_i32 = arith.constant 0 : i32
    %c0_i32_0 = arith.constant 0 : i32
    %c0_i32_1 = arith.constant 0 : i32
    return %c0_i32, %c0_i32_0 : i32, i32
  }
  func.func @transform_13(%arg0: i32) -> (i32, i32) {
    %c0_i32 = arith.constant 0 : i32
    %c0_i32_0 = arith.constant 0 : i32
    %c0_i32_1 = arith.constant 0 : i32
    return %c0_i32, %c0_i32_0 : i32, i32
  }
  func.func @transform_14(%arg0: i32) -> (i32, i32) {
    %c0_i32 = arith.constant 0 : i32
    %c0_i32_0 = arith.constant 0 : i32
    %c0_i32_1 = arith.constant 0 : i32
    return %c0_i32, %c0_i32_0 : i32, i32
  }
  func.func @transform_15(%arg0: i32) -> (i32, i32, i32) {
    %c0_i32 = arith.constant 0 : i32
    %c0_i32_0 = arith.constant 0 : i32
    %c0_i32_1 = arith.constant 0 : i32
    return %arg0, %c0_i32, %c0_i32_0 : i32, i32, i32
  }
}

module attributes {stable_mosaic.version = 11 : i64} {
  func.func @lm_head_kernel(%arg0: i32, %arg1: i32, %arg2: memref<16x32xbf16, #tpu.memory_space<vmem>>, %arg3: memref<32x256xbf16, #tpu.memory_space<vmem>>, %arg4: memref<1x256xf32, #tpu.memory_space<vmem>>, %arg5: memref<16x256xf32, #tpu.memory_space<vmem>>) attributes {dimension_semantics = [#tpu.dimension_semantics<parallel>, #tpu.dimension_semantics<arbitrary>], iteration_bounds = array<i64: 1, 1>, scalar_prefetch = 0 : i64, scratch_operands = 0 : i64, tpu.core_type = #tpu.core_type<tc>, window_params = [{transform_indices = @transform_0, window_bounds = array<i64: 16, 32>}, {transform_indices = @transform_1, window_bounds = array<i64: 32, 256>}, {transform_indices = @transform_2, window_bounds = array<i64: 1, 256>}, {transform_indices = @transform_3, window_bounds = array<i64: 16, 256>}]} {
    %c0 = arith.constant 0 : index
    %c0_0 = arith.constant 0 : index
    %0 = vector.load %arg2[%c0, %c0_0] : memref<16x32xbf16, #tpu.memory_space<vmem>>, vector<16x32xbf16>
    %c0_1 = arith.constant 0 : index
    %c0_2 = arith.constant 0 : index
    %1 = vector.load %arg3[%c0_1, %c0_2] : memref<32x256xbf16, #tpu.memory_space<vmem>>, vector<32x256xbf16>
    %cst = arith.constant dense<0.000000e+00> : vector<16x256xf32>
    %2 = tpu.matmul %0, %1, %cst {dimension_numbers = #tpu.dot_dimension_numbers<[1], [0], [0], [1], [0, 0, 1, 1], [], []>} : vector<16x32xbf16>, vector<32x256xbf16>, vector<16x256xf32> -> vector<16x256xf32>
    %c0_3 = arith.constant 0 : index
    %c0_4 = arith.constant 0 : index
    %3 = vector.load %arg4[%c0_3, %c0_4] : memref<1x256xf32, #tpu.memory_space<vmem>>, vector<1x256xf32>
    %4 = vector.broadcast %3 : vector<1x256xf32> to vector<16x256xf32>
    %5 = arith.addf %2, %4 : vector<16x256xf32>
    %c0_5 = arith.constant 0 : index
    %c0_6 = arith.constant 0 : index
    %6 = vector.load %arg5[%c0_5, %c0_6] : memref<16x256xf32, #tpu.memory_space<vmem>>, vector<16x256xf32>
    tpu.vector_store %arg5[%c0_5, %c0_6], %5 {strides = array<i32>} : memref<16x256xf32, #tpu.memory_space<vmem>>, vector<16x256xf32>,
    return
  }
  func.func @transform_0(%arg0: i32, %arg1: i32) -> (i32, i32) {
    %c0_i32 = arith.constant 0 : i32
    %c0_i32_0 = arith.constant 0 : i32
    return %arg1, %c0_i32 : i32, i32
  }
  func.func @transform_1(%arg0: i32, %arg1: i32) -> (i32, i32) {
    %c0_i32 = arith.constant 0 : i32
    %c0_i32_0 = arith.constant 0 : i32
    return %c0_i32, %arg0 : i32, i32
  }
  func.func @transform_2(%arg0: i32, %arg1: i32) -> (i32, i32) {
    %c0_i32 = arith.constant 0 : i32
    %c0_i32_0 = arith.constant 0 : i32
    return %c0_i32, %arg0 : i32, i32
  }
  func.func @transform_3(%arg0: i32, %arg1: i32) -> (i32, i32) {
    %c0_i32 = arith.constant 0 : i32
    return %arg1, %arg0 : i32, i32
  }
}

</mosaic_0001>

<bundles_post_ra>
// kernel: gpt3_like_forward.5
= control target key start
LH: loop header
LB: loop body
LE: loop exit
PB: predicated region body
PF: predicated region fallthrough
CT: control target
= control target key end

     0   :  { %v127_v1 = vmov 0   ;;  %vm58_vm0 = vcmask 261120   ;;  %v23_v6 = vlaneseq  ;;  %s178_s1 = inlined_call_operand.vmem [shape: bf16[32,256], index: 1, kind: input, shape index: {}]   ;;  %s179_s0 = inlined_call_operand.vmem [shape: bf16[16,32], index: 0, kind: input, shape index: {}]   ;;  %s180_s2 = inlined_call_operand.vmem [shape: f32[1,256], index: 2, kind: input, shape index: {}]   ;;  %s181_s3 = inlined_call_operand.vmem [shape: f32[16,256], index: 3, kind: output, shape index: {}]  }
   0x1   :  { %v120_v0 = vld [vmem:[%s178_s1 + $0x14] ss:$8 sps:$4 sm:$0xff]   ;;  %94 = vmatprep.mubr.bf16.mxu0 %v127_v1  ;;  %v122_v2 = vld [vmem:[%s178_s1 + $0x10] ss:$8 sps:$4 sm:$0xff]   ;;  %v123_v3 = vld [vmem:[%s178_s1 + $0x4] ss:$8 sps:$4 sm:$0xff]  }
   0x2   :  { %74 = vmatprep.subr.bf16.mxu0 %v120_v0  ;;  %v125_v4 = vld [vmem:[%s178_s1] ss:$8 sps:$4 sm:$0xff]   ;;  %v24_v7 = vshrl.u32 %v23_v6, 7 }
   0x3   :  { %75 = vmatpush1.bf16.msra.mxu0 %v122_v2  ;;  %v126_v5 = vld [vmem:[%s179_s0] sm:$0xff]  }
   0x4   :  { %76 = vmatprep.subr.bf16.mxu0 %v123_v3  ;;  %v25_v8 = vsub.s32 0, %v24_v7  ;;  %v21_v9 = vld [vmem:[%s180_s2] sm:$0x3]  ;;  %v29_v10 = vsub.s32 1, %v24_v7 }
   0x6   :  { %v26_v11 = vrot.slane %v21_v9, %v25_v8  ;;  %v30_v12 = vrot.slane %v21_v9, %v29_v10 }
   0x7   :  { %77 = vmatpush1.bf16.msra.mxu0 %v125_v4 }
   0xa   :  { %118 = vmatmul.mubr.msk.bf16.vlgmr.msra.gmra.mxu0 %vm58_vm0, %v126_v5 }
  0xca   :  { %v96_v13 = vpop.f32.mrf.mxu0 }
  0xcb   :  { %v97_v14 = vadd.f32 %v96_v13, %v26_v11 }
  0xcc   :  { %v98_v15 = vpop.f32.mrf.mxu0 }
  0xcd   :  { %105 = vst [vmem:[%s181_s3] sm:$0xff] %v97_v14  ;;  %v99_v16 = vadd.f32 %v98_v15, %v30_v12 }
  0xce   :  { %v100_v17 = vpop.f32.mrf.mxu0 }
  0xcf   :  { %106 = vst [vmem:[%s181_s3 + $0x8] sm:$0xff] %v99_v16  ;;  %v101_v18 = vadd.f32 %v100_v17, %v26_v11 }
  0xd0   :  { %v102_v19 = vpop.f32.mrf.mxu0 }
  0xd1   :  { %107 = vst [vmem:[%s181_s3 + $0x10] sm:$0xff] %v101_v18  ;;  %v103_v20 = vadd.f32 %v102_v19, %v30_v12 }
  0xd3   :  { %108 = vst [vmem:[%s181_s3 + $0x18] sm:$0xff] %v103_v20 }

// kernel: gpt3_like_forward.3
= control target key start
LH: loop header
LB: loop body
LE: loop exit
PB: predicated region body
PF: predicated region fallthrough
CT: control target
= control target key end

     0   :  { %v72_v0 = vlaneseq  ;;  %v2210_v1 = vmov 0.0   ;;  %vm2211_vm0 = vmmov 0   ;;  %v2212_v3 = vmov 1983009808   ;;  %s2806_s3 = inlined_call_operand.vmem [shape: bf16[32,96], index: 3, kind: input, shape index: {}]   ;;  %s2807_s0 = inlined_call_operand.vmem [shape: f32[8,2,32], index: 0, kind: input, shape index: {}]   ;;  %s2808_s4 = inlined_call_operand.vmem [shape: f32[1,96], index: 4, kind: input, shape index: {}]   ;;  %s2809_s1 = inlined_call_operand.vmem [shape: bf16[32,4], index: 1, kind: input, shape index: {}]   ;;  %s2810_s2 = inlined_call_operand.vmem [shape: bf16[4,32], index: 2, kind: input, shape index: {}]   ;;  %s2811_s5 = inlined_call_operand.vmem [shape: bf16[32,32], index: 5, kind: input, shape index: {}]   ;;  %s2812_s6 = inlined_call_operand.vmem [shape: f32[1,32], index: 6, kind: input, shape index: {}]   ;;  %s2813_s9 = inlined_call_operand.vmem [shape: bf16[32,64], index: 9, kind: input, shape index: {}]   ;;  %s2814_s11 = inlined_call_operand.vmem [shape: bf16[64,32], index: 11, kind: input, shape index: {}]   ;;  %s2815_s7 = inlined_call_operand.vmem [shape: f32[1,32], index: 7, kind: input, shape index: {}]   ;;  %s2816_s8 = inlined_call_operand.vmem [shape: f32[1,32], index: 8, kind: input, shape index: {}]   ;;  %s2817_s10 = inlined_call_operand.vmem [shape: f32[1,64], index: 10, kind: input, shape index: {}]   ;;  %s2818_s12 = inlined_call_operand.vmem [shape: f32[1,32], index: 12, kind: input, shape index: {}]   ;;  %s2819_s13 = inlined_call_operand.vmem [shape: f32[1,32], index: 13, kind: input, shape index: {}]   ;;  %s2820_s14 = inlined_call_operand.vmem [shape: f32[1,32], index: 14, kind: input, shape index: {}]   ;;  %s2821_s15 = inlined_call_operand.vmem [shape: f32[8,2,32], index: 15, kind: output, shape index: {}]  }
   0x1   :  { %2105 = vmatprep.subr.bf16.mxu0 %v2210_v1  ;;  %v2178_v2 = vld [vmem:[%s2806_s3 + $0x8] sm:$0xff]   ;;  %2109 = vmatprep.mubr.msk.bf16.mxu0 %vm2211_vm0, %v2210_v1  ;;  %v70_v4 = vunpack.c.l.s4 %v2212_v3  ;;  %v2179_v5 = vld [vmem:[%s2806_s3] sm:$0xff]   ;;  %vm127_vm1 = vcmask 261120   ;;  %vm696_vm2 = vcmask 1041408   ;;  %vm692_vm3 = vcmask 31744  }
   0x2   :  { %v2308_v6 = vshrl.u32 %v72_v0, 7  ;;  %2113 = vmatprep.subr.bf16.mxu1 %v2210_v1  ;;  %2117 = vmatprep.mubr.msk.bf16.mxu1 %vm2211_vm0, %v2210_v1  ;;  %v2316_v7 = vld [vmem:[%s2807_s0] sm:$0x3]  ;;  %v2321_v8 = vld [vmem:[%s2807_s0 + $0x2] sm:$0x3]  ;;  %vm1609_vm4 = vcmask 523264  }
   0x3   :  { %2106 = vmatpush3.bf16.msra.mxu0 %v2178_v2  ;;  %v2326_v9 = vld [vmem:[%s2807_s0 + $0x4] sm:$0x3]  ;;  %v71_v10 = vunpack.c.0.s8 %v70_v4  ;;  %v2332_v11 = vld [vmem:[%s2807_s0 + $0x6] sm:$0x3]  ;;  %v2337_v12 = vld [vmem:[%s2807_s0 + $0x8] sm:$0x3]  ;;  %v67_v14 = vcombine.low %v2316_v7, %v2321_v8 }
   0x4   :  { %2107 = vmatprep.subr.bf16.mxu0 %v2210_v1  ;;  %v2342_v13 = vld [vmem:[%s2807_s0 + $0xa] sm:$0x3]  ;;  %v2349_v15 = vld [vmem:[%s2807_s0 + $0xc] sm:$0x3]  ;;  %v2354_v16 = vld [vmem:[%s2807_s0 + $0xe] sm:$0x3]  ;;  %v68_v17 = vcombine.low %v2326_v9, %v2332_v11 }
   0x5   :  { %v2359_v18 = vsub.s32 %v71_v10, %v2308_v6  ;;  %v84_v19 = vcombine.low %v2337_v12, %v2342_v13  ;;  %v85_v20 = vcombine.low %v2349_v15, %v2354_v16  ;;  %v2053_v28 = vld [vmem:[%s2808_s4] ss:$0 sm:$0xff]  ;;  %v2377_v31 = vsub.s32 0, %v2308_v6  ;;  %s2213_s4 = smov 96   ;;  %v2180_v10 = vld [vmem:[%s2809_s1 + $0x8] sm:$0xff]  }
   0x6   :  { %v2383_v35 = vsub.s32 1, %v2308_v6  ;;  %2114 = vmatpush3.bf16.msra.mxu1 %v2180_v10  ;;  %vm2040_vm5 = vcmask 254976  }
   0x7   :  { %2108 = vmatpush3.bf16.msra.mxu0 %v2179_v5  ;;  %v75_v21 = vrot.slane %v67_v14, %v2359_v18  ;;  %v82_v22 = vrot.slane %v68_v17, %v2359_v18  ;;  %v92_v23 = vrot.slane %v84_v19, %v2359_v18  ;;  %v99_v24 = vrot.slane %v85_v20, %v2359_v18 }
   0x8   :  { %2121 = vmatprep.subr.bf16.mxu0 %v2210_v1  ;;  %2115 = vmatprep.subr.bf16.mxu1 %v2210_v1 }
   0x9   :  { %v83_v25 = vcombine.low %v75_v21, %v82_v22  ;;  %v100_v26 = vcombine.low %v92_v23, %v99_v24  ;;  %v2181_v21 = vld [vmem:[%s2809_s1] sm:$0xff]   ;;  %s2214_s1 = smov 64  }
   0xa   :  { %2116 = vmatpush3.bf16.msra.mxu1 %v2181_v21 }
   0xb   :  { %v103_v27 = vpack.c.bf16 %v100_v26, %v83_v25  ;;  %2129 = vmatprep.subr.bf16.mxu1 %v2210_v1 }
   0xd   :  { %2110 = vmatmul.mubr.msk.bf16.vlgmr.msra.gmra.mxu0 %vm127_vm1, %v103_v27 }
   0xe   :  { %2125 = vmatprep.mubr.msk.bf16.mxu0 %vm2211_vm0, %v2210_v1  ;;  %2122 = vmatpush3.bf16.msra.mxu0 %v2180_v10 }
   0xf   :  { %2123 = vmatprep.subr.bf16.mxu0 %v2210_v1 }
  0x12   :  { %2124 = vmatpush3.bf16.msra.mxu0 %v2181_v21 }
  0x13   :  { %2135 = vmatprep.subr.bf16.mxu0 %v2210_v1 }
  0xcd   :  { %v165_v29 = vpop.f32.mrf.mxu0 }
  0xce   :  { %v166_v30 = vadd.f32 %v2053_v28, %v165_v29 }
  0xcf   :  { %v2111_v32 = vpop.f32.mrf.mxu0 }
  0xd0   :  { %v174_v33 = vcombine.high %v166_v30, %v166_v30  ;;  %v2380_v34 = vrot.slane %v166_v30, %v2359_v18 }
  0xd1   :  { %v168_v36 = vpop.f32.mrf.mxu0 }
  0xd2   :  { %v2386_v37 = vrot.slane %v174_v33, %v2359_v18  ;;  %v224_v38 = vrot.slane %v2380_v34, %v2377_v31  ;;  %v2392_v40 = vcombine.high %v2380_v34, %v2380_v34  ;;  %v455_v43 = vrot.slane %v2380_v34, %v2383_v35 }
  0xd3   :  { %v2112_v39 = vpop.f32.mrf.mxu0  ;;  %v169_v44 = vadd.f32 %v2053_v28, %v168_v36 }
  0xd4   :  { %v2395_v41 = vrot.slane %v224_v38, %v2359_v18  ;;  %v232_v42 = vrot.slane %v2386_v37, %v2377_v31  ;;  %v459_v46 = vrot.slane %v2392_v40, %v2383_v35  ;;  %v2408_v47 = vcombine.high %v2386_v37, %v2386_v37 }
  0xd5   :  { %v2412_v48 = vrot.slane %v455_v43, %v2359_v18  ;;  %v228_v49 = vrot.slane %v2392_v40, %v2377_v31  ;;  %v2417_v50 = vrot.slane %v169_v44, %v2359_v18  ;;  %v463_v54 = vrot.slane %v2386_v37, %v2383_v35 }
  0xd6   :  { %317 = vrot.lane.b32.xlu0 %v2395_v41, %s2213_s4  ;;  %v281_v45 = vrot.slane %v232_v42, %v2359_v18  ;;  %v505_v51 = vrot.slane %v459_v46, %v2359_v18  ;;  %v236_v52 = vrot.slane %v2408_v47, %v2377_v31  ;;  %v191_v55 = vcombine.high %v169_v44, %v169_v44 }
  0xd7   :  { %v274_v53 = vrot.slane %v228_v49, %v2359_v18  ;;  %v467_v57 = vrot.slane %v2408_v47, %v2383_v35  ;;  %v2434_v58 = vcombine.high %v2417_v50, %v2417_v50  ;;  %v512_v59 = vrot.slane %v463_v54, %v2359_v18 }
  0xd8   :  { %321 = vrot.lane.b32.xlu1 %v281_v45, %s2213_s4  ;;  %v288_v56 = vrot.slane %v236_v52, %v2359_v18  ;;  %v240_v60 = vrot.slane %v2417_v50, %v2377_v31  ;;  %v2441_v61 = vrot.slane %v191_v55, %v2359_v18  ;;  %v471_v2 = vrot.slane %v2417_v50, %v2383_v35 }
  0xd9   :  { %v519_v62 = vrot.slane %v467_v57, %v2359_v18  ;;  %v244_v63 = vrot.slane %v2434_v58, %v2377_v31  ;;  %v475_v4 = vrot.slane %v2434_v58, %v2383_v35 }
  0xda   :  { %548 = vrot.lane.b32.xlu0 %v2412_v48, %s2213_s4  ;;  %v295_v0 = vrot.slane %v240_v60, %v2359_v18  ;;  %v2457_v5 = vcombine.high %v2441_v61, %v2441_v61  ;;  %v526_v14 = vrot.slane %v471_v2, %v2359_v18  ;;  %v248_v17 = vrot.slane %v2441_v61, %v2377_v31 }
  0xdb   :  { %v302_v3 = vrot.slane %v244_v63, %v2359_v18  ;;  %v533_v19 = vrot.slane %v475_v4, %v2359_v18  ;;  %v479_v23 = vrot.slane %v2441_v61, %v2383_v35 }
  0xdc   :  { %550 = vrot.lane.b32.xlu1 %v505_v51, %s2213_s4  ;;  %v252_v20 = vrot.slane %v2457_v5, %v2377_v31  ;;  %v309_v22 = vrot.slane %v248_v17, %v2359_v18  ;;  %v483_v25 = vrot.slane %v2457_v5, %v2383_v35 }
  0xdd   :  { %v540_v26 = vrot.slane %v479_v23, %v2359_v18 }
  0xde   :  { %319 = vrot.lane.b32.xlu0 %v274_v53, %s2213_s4  ;;  %v316_v24 = vrot.slane %v252_v20, %v2359_v18  ;;  %v547_v27 = vrot.slane %v483_v25, %v2359_v18 }
  0xe0   :  { %323 = vrot.lane.b32.xlu1 %v288_v56, %s2213_s4 }
  0xe2   :  { %552 = vrot.lane.b32.xlu0 %v512_v59, %s2213_s4 }
  0xe4   :  { %554 = vrot.lane.b32.xlu1 %v519_v62, %s2213_s4 }
  0xe6   :  { %325 = vrot.lane.b32.xlu0 %v295_v0, %s2213_s4 }
  0xe8   :  { %327 = vrot.lane.b32.xlu1 %v302_v3, %s2213_s4 }
  0xea   :  { %556 = vrot.lane.b32.xlu0 %v526_v14, %s2213_s4 }
  0xec   :  { %558 = vrot.lane.b32.xlu1 %v533_v19, %s2213_s4 }
  0xee   :  { %329 = vrot.lane.b32.xlu0 %v309_v22, %s2213_s4 }
  0xf0   :  { %331 = vrot.lane.b32.xlu1 %v316_v24, %s2213_s4 }
  0xf2   :  { %560 = vrot.lane.b32.xlu0 %v540_v26, %s2213_s4 }
  0xf4   :  { %562 = vrot.lane.b32.xlu1 %v547_v27, %s2213_s4 }
  0xf6   :  { %785 = vrot.lane.b32.xlu0 %v2395_v41, %s2214_s1 }
  0xf8   :  { %787 = vrot.lane.b32.xlu1 %v274_v53, %s2214_s1 }
  0xfa   :  { %789 = vrot.lane.b32.xlu0 %v281_v45, %s2214_s1 }
  0xfc   :  { %791 = vrot.lane.b32.xlu1 %v288_v56, %s2214_s1 }
  0xfe   :  { %793 = vrot.lane.b32.xlu0 %v295_v0, %s2214_s1 }
 0x100   :  { %795 = vrot.lane.b32.xlu1 %v302_v3, %s2214_s1 }
 0x102   :  { %797 = vrot.lane.b32.xlu0 %v309_v22, %s2214_s1 }
 0x104   :  { %918 = vrot.lane.b32.xlu1 %v505_v51, %s2214_s1 }
 0x106   :  { %916 = vrot.lane.b32.xlu0 %v2412_v48, %s2214_s1 }
 0x108   :  { %922 = vrot.lane.b32.xlu1 %v519_v62, %s2214_s1 }
 0x10a   :  { %920 = vrot.lane.b32.xlu0 %v512_v59, %s2214_s1 }
 0x10c   :  { %926 = vrot.lane.b32.xlu1 %v533_v19, %s2214_s1 }
 0x10e   :  { %924 = vrot.lane.b32.xlu0 %v526_v14, %s2214_s1 }
 0x110   :  { %799 = vrot.lane.b32.xlu1 %v316_v24, %s2214_s1 }
 0x112   :  { %928 = vrot.lane.b32.xlu0 %v540_v26, %s2214_s1 }
 0x114   :  { %930 = vrot.lane.b32.xlu1 %v547_v27, %s2214_s1 }
 0x148   :  { %v318_v28 = vpop.permute.xlu0 %317 }
 0x149   :  { %v341_v48 = vmul.f32 %v318_v28, %v2380_v34 }
 0x14a   :  { %v322_v29 = vpop.permute.xlu1 %321 }
 0x14b   :  { %v343_v46 = vmul.f32 %v322_v29, %v2386_v37 }
 0x14c   :  { %v549_v30 = vpop.permute.xlu0 %548 }
 0x14d   :  { %v572_v0 = vmul.f32 %v549_v30, %v2380_v34 }
 0x14e   :  { %v551_v31 = vpop.permute.xlu1 %550 }
 0x14f   :  { %v573_v54 = vmul.f32 %v551_v31, %v2392_v40 }
 0x150   :  { %v320_v32 = vpop.permute.xlu0 %319 }
 0x151   :  { %v342_v43 = vmul.f32 %v320_v32, %v2392_v40  ;;  %v588_v10 = vcombine.low %v572_v0, %v573_v54 }
 0x152   :  { %v324_v33 = vpop.permute.xlu1 %323 }
 0x153   :  { %v344_v42 = vmul.f32 %v324_v33, %v2408_v47  ;;  %v357_v55 = vcombine.low %v341_v48, %v342_v43 }
 0x154   :  { %v553_v35 = vpop.permute.xlu0 %552 }
 0x155   :  { %v358_v52 = vcombine.low %v343_v46, %v344_v42  ;;  %v574_v59 = vmul.f32 %v553_v35, %v2386_v37  ;;  %v365_v14 = vrot.slane %v357_v55, %v2359_v18 }
 0x156   :  { %v555_v36 = vpop.permute.xlu1 %554 }
 0x157   :  { %v575_v53 = vmul.f32 %v555_v36, %v2408_v47  ;;  %v372_v3 = vrot.slane %v358_v52, %v2359_v18 }
 0x158   :  { %v326_v38 = vpop.permute.xlu0 %325 }
 0x159   :  { %v345_v49 = vmul.f32 %v326_v38, %v2417_v50  ;;  %v589_v4 = vcombine.low %v574_v59, %v575_v53  ;;  %v373_v21 = vcombine.low %v365_v14, %v372_v3 }
 0x15a   :  { %v328_v39 = vpop.permute.xlu1 %327 }
 0x15b   :  { %v346_v44 = vmul.f32 %v328_v39, %v2434_v58  ;;  %v603_v22 = vrot.slane %v589_v4, %v2359_v18 }
 0x15c   :  { %v557_v41 = vpop.permute.xlu0 %556 }
 0x15d   :  { %v374_v56 = vcombine.low %v345_v49, %v346_v44  ;;  %v576_v47 = vmul.f32 %v557_v41, %v2417_v50  ;;  %v596_v50 = vrot.slane %v588_v10, %v2359_v18 }
 0x15e   :  { %v559_v45 = vpop.permute.xlu1 %558 }
 0x15f   :  { %v577_v60 = vmul.f32 %v559_v45, %v2434_v58  ;;  %v382_v37 = vrot.slane %v374_v56, %v2359_v18  ;;  %v604_v28 = vcombine.low %v596_v50, %v603_v22 }
 0x160   :  { %v330_v51 = vpop.permute.xlu0 %329 }
 0x161   :  { %v347_v62 = vmul.f32 %v330_v51, %v2441_v61  ;;  %v605_v58 = vcombine.low %v576_v47, %v577_v60 }
 0x162   :  { %v332_v57 = vpop.permute.xlu1 %331 }
 0x163   :  { %v348_v63 = vmul.f32 %v332_v57, %v2457_v5  ;;  %v613_v25 = vrot.slane %v605_v58, %v2359_v18  ;;  %v2182_v58 = vld [vmem:[%s2811_s5 + $0x8] sm:$0xff]  }
 0x164   :  { %v561_v2 = vpop.permute.xlu0 %560 }
 0x165   :  { %v375_v40 = vcombine.low %v347_v62, %v348_v63  ;;  %v578_v20 = vmul.f32 %v561_v2, %v2441_v61 }
 0x166   :  { %v563_v17 = vpop.permute.xlu1 %562 }
 0x167   :  { %v389_v19 = vrot.slane %v375_v40, %v2359_v18  ;;  %v579_v34 = vmul.f32 %v563_v17, %v2457_v5  ;;  %v220_v5 = vld [vmem:[%s2810_s2] sm:$0x3] }
 0x168   :  { %v698_v30 = vsel %vm696_vm2, %v220_v5, 0 }
 0x169   :  { %v390_v23 = vcombine.low %v382_v37, %v389_v19  ;;  %v606_v24 = vcombine.low %v578_v20, %v579_v34  ;;  %v2183_v19 = vld [vmem:[%s2811_s5] sm:$0xff]   ;;  %v786_v20 = vpop.permute.xlu0 %785 }
 0x16a   :  { %v788_v34 = vpop.permute.xlu1 %787 }
 0x16b   :  { %v620_v26 = vrot.slane %v606_v24, %v2359_v18  ;;  %v393_v27 = vpack.c.bf16 %v390_v23, %v373_v21 }
 0x16d   :  { %v621_v29 = vcombine.low %v613_v25, %v620_v26  ;;  %2118 = vmatmul.mubr.msk.bf16.vlgmr.msra.gmra.mxu1 %vm127_vm1, %v393_v27  ;;  %v790_v21 = vpop.permute.xlu0 %789 }
 0x16e   :  { %2131 = vmatprep.mubr.msk.bf16.mxu1 %vm2211_vm0, %v2210_v1  ;;  %2130 = vmatpush3.bf16.msra.mxu1 %v698_v30  ;;  %v792_v22 = vpop.permute.xlu1 %791 }
 0x16f   :  { %v624_v61 = vpack.c.bf16 %v621_v29, %v604_v28  ;;  %2141 = vmatprep.subr.bf16.mxu1 %v2210_v1 }
 0x171   :  { %2126 = vmatmul.mubr.msk.bf16.vlgmr.msra.gmra.mxu0 %vm127_vm1, %v624_v61  ;;  %v794_v23 = vpop.permute.xlu0 %793 }
 0x172   :  { %2137 = vmatprep.mubr.msk.bf16.mxu0 %vm2211_vm0, %v2210_v1  ;;  %2136 = vmatpush3.bf16.msra.mxu0 %v698_v30  ;;  %v796_v24 = vpop.permute.xlu1 %795 }
 0x173   :  { %2149 = vmatprep.subr.bf16.mxu0 %v2210_v1 }
 0x175   :  { %v798_v50 = vpop.permute.xlu0 %797 }
 0x176   :  { %v919_v25 = vpop.permute.xlu1 %918 }
 0x179   :  { %v917_v26 = vpop.permute.xlu0 %916 }
 0x17a   :  { %v923_v27 = vpop.permute.xlu1 %922 }
 0x17d   :  { %v921_v28 = vpop.permute.xlu0 %920 }
 0x17e   :  { %v927_v29 = vpop.permute.xlu1 %926 }
 0x22d   :  { %v443_v31 = vpop.f32.mrf.mxu1 }
 0x22e   :  { %v450_v36 = vmul.f32 0.35355338, %v443_v31 }
 0x22f   :  { %v2119_v32 = vpop.f32.mrf.mxu1 }
 0x231   :  { %v446_v33 = vpop.f32.mrf.mxu1  ;;  %v662_v35 = vpop.f32.mrf.mxu0 }
 0x232   :  { %v669_v38 = vmul.f32 0.35355338, %v662_v35  ;;  %v451_v44 = vmul.f32 0.35355338, %v446_v33 }
 0x233   :  { %v2120_v39 = vpop.f32.mrf.mxu1  ;;  %v2127_v41 = vpop.f32.mrf.mxu0 }
 0x234   :  { %v671_v42 = vmax.f32 %v450_v36, %v669_v38 }
 0x235   :  { %v665_v43 = vpop.f32.mrf.mxu0 }
 0x236   :  { %v673_v45 = vsub.f32 %v450_v36, %v671_v42  ;;  %v679_v46 = vsub.f32 %v669_v38, %v671_v42  ;;  %v670_v48 = vmul.f32 0.35355338, %v665_v43 }
 0x237   :  { %v2128_v49 = vpop.f32.mrf.mxu0 }
 0x238   :  { %v675_v51 = vmul.f32 1.442695, %v673_v45  ;;  %v681_v52 = vmul.f32 1.442695, %v679_v46  ;;  %v672_v53 = vmax.f32 %v451_v44, %v670_v48  ;;  %v925_v45 = vpop.permute.xlu0 %924  ;;  %v800_v46 = vpop.permute.xlu1 %799 }
 0x23a   :  { %2190 = vpow2.f32 %v675_v51  ;;  %v674_v54 = vsub.f32 %v451_v44, %v672_v53  ;;  %v680_v55 = vsub.f32 %v670_v48, %v672_v53 }
 0x23b   :  { %2192 = vpow2.f32 %v681_v52 }
 0x23c   :  { %v677_v56 = vmul.f32 1.442695, %v674_v54  ;;  %v683_v57 = vmul.f32 1.442695, %v680_v55 }
 0x23e   :  { %2194 = vpow2.f32 %v677_v56 }
 0x23f   :  { %2196 = vpow2.f32 %v683_v57 }
 0x247   :  { %v2191_v59 = vpop.eup %2190 }
 0x248   :  { %v2193_v60 = vpop.eup %2192 }
 0x249   :  { %v685_v62 = vadd.f32 %v2193_v60, %v2191_v59 }
 0x24b   :  { %v2195_v63 = vpop.eup %2194  ;;  %2198 = vrcp.f32 %v685_v62 }
 0x24c   :  { %v2197_v0 = vpop.eup %2196 }
 0x24d   :  { %v686_v2 = vadd.f32 %v2197_v0, %v2195_v63 }
 0x24f   :  { %2200 = vrcp.f32 %v686_v2 }
 0x258   :  { %v2199_v3 = vpop.eup %2198 }
 0x259   :  { %v689_v47 = vmul.f32 %v2199_v3, %v2191_v59  ;;  %v825_v10 = vmul.f32 %v2199_v3, %v2193_v60 }
 0x25c   :  { %v2201_v4 = vpop.eup %2200 }
 0x25d   :  { %v690_v40 = vmul.f32 %v2201_v4, %v2195_v63  ;;  %v826_v14 = vmul.f32 %v2201_v4, %v2197_v0 }
 0x25f   :  { %v691_v37 = vpack.c.bf16 %v690_v40, %v689_v47  ;;  %v827_v17 = vpack.c.bf16 %v826_v14, %v825_v10 }
 0x261   :  { %2132 = vmatmul.mubr.msk.bf16.vlgmr.msra.gmra.mxu1 %vm692_vm3, %v691_v37  ;;  %2138 = vmatmul.mubr.msk.bf16.vlgmr.msra.gmra.mxu0 %vm692_vm3, %v827_v17 }
 0x262   :  { %2145 = vmatprep.mubr.msk.bf16.mxu1 %vm2211_vm0, %v2210_v1  ;;  %2153 = vmatprep.mubr.msk.bf16.mxu0 %vm2211_vm0, %v2210_v1 }
 0x263   :  { %2142 = vmatpush3.bf16.msra.mxu1 %v2182_v58 }
 0x264   :  { %2143 = vmatprep.subr.bf16.mxu1 %v2210_v1 }
 0x267   :  { %2144 = vmatpush3.bf16.msra.mxu1 %v2183_v19 }
 0x268   :  { %2157 = vmatprep.subr.bf16.mxu1 %v2210_v1 }
 0x321   :  { %v734_v61 = vpop.f32.mrf.mxu1  ;;  %v865_v5 = vpop.f32.mrf.mxu0 }
 0x322   :  { %v743_v30 = vcombine.high %v734_v61, %v734_v61  ;;  %v750_v31 = vrot.slane %v734_v61, %v2359_v18  ;;  %v874_v32 = vcombine.high %v865_v5, %v865_v5  ;;  %v881_v33 = vrot.slane %v865_v5, %v2359_v18 }
 0x323   :  { %v2133_v35 = vpop.f32.mrf.mxu1  ;;  %v2139_v36 = vpop.f32.mrf.mxu0 }
 0x324   :  { %v757_v38 = vrot.slane %v743_v30, %v2359_v18  ;;  %v758_v39 = vcombine.high %v750_v31, %v750_v31  ;;  %v888_v41 = vrot.slane %v874_v32, %v2359_v18  ;;  %v889_v42 = vcombine.high %v881_v33, %v881_v33 }
 0x325   :  { %v737_v43 = vpop.f32.mrf.mxu1  ;;  %v868_v44 = vpop.f32.mrf.mxu0  ;;  %v809_v0 = vmul.f32 %v786_v20, %v750_v31  ;;  %v940_v2 = vmul.f32 %v917_v26, %v881_v33 }
 0x326   :  { %v759_v48 = vcombine.high %v757_v38, %v757_v38  ;;  %v810_v49 = vmul.f32 %v788_v34, %v758_v39  ;;  %v890_v51 = vcombine.high %v888_v41, %v888_v41  ;;  %v811_v52 = vmul.f32 %v790_v21, %v757_v38  ;;  %v929_v34 = vpop.permute.xlu0 %928  ;;  %v931_v20 = vpop.permute.xlu1 %930 }
 0x327   :  { %v941_v53 = vmul.f32 %v919_v25, %v889_v42  ;;  %v942_v54 = vmul.f32 %v921_v28, %v888_v41  ;;  %v760_v55 = vcombine.high %v737_v43, %v737_v43  ;;  %v2134_v56 = vpop.f32.mrf.mxu1  ;;  %v2140_v57 = vpop.f32.mrf.mxu0  ;;  %v767_v62 = vrot.slane %v737_v43, %v2359_v18 }
 0x328   :  { %v812_v59 = vmul.f32 %v792_v22, %v759_v48  ;;  %v943_v60 = vmul.f32 %v923_v27, %v890_v51  ;;  %v891_v63 = vcombine.high %v868_v44, %v868_v44  ;;  %v898_v4 = vrot.slane %v868_v44, %v2359_v18 }
 0x329   :  { %v774_v3 = vrot.slane %v760_v55, %v2359_v18  ;;  %v949_v47 = vadd.f32 %v941_v53, %v810_v49  ;;  %v775_v10 = vcombine.high %v767_v62, %v767_v62  ;;  %v950_v37 = vadd.f32 %v942_v54, %v811_v52 }
 0x32a   :  { %v951_v40 = vadd.f32 %v943_v60, %v812_v59  ;;  %v905_v14 = vrot.slane %v891_v63, %v2359_v18  ;;  %v813_v58 = vmul.f32 %v794_v23, %v767_v62  ;;  %v906_v19 = vcombine.high %v898_v4, %v898_v4 }
 0x32b   :  { %v776_v17 = vcombine.high %v774_v3, %v774_v3  ;;  %v814_v21 = vmul.f32 %v796_v24, %v775_v10  ;;  %v815_v22 = vmul.f32 %v798_v50, %v774_v3  ;;  %v944_v27 = vmul.f32 %v925_v45, %v898_v4  ;;  %v2063_v45 = vld [vmem:[%s2812_s6] ss:$0 sm:$0xff] }
 0x32c   :  { %v907_v25 = vcombine.high %v905_v14, %v905_v14  ;;  %v945_v28 = vmul.f32 %v927_v29, %v906_v19  ;;  %v946_v61 = vmul.f32 %v929_v34, %v905_v14  ;;  %v948_v5 = vadd.f32 %v940_v2, %v809_v0 }
 0x32d   :  { %v816_v26 = vmul.f32 %v800_v46, %v776_v17  ;;  %v965_v30 = vcombine.low %v950_v37, %v951_v40  ;;  %v952_v32 = vadd.f32 %v944_v27, %v813_v58 }
 0x32e   :  { %v947_v31 = vmul.f32 %v931_v20, %v907_v25  ;;  %v953_v33 = vadd.f32 %v945_v28, %v814_v21  ;;  %v964_v35 = vcombine.low %v948_v5, %v949_v47  ;;  %v954_v36 = vadd.f32 %v946_v61, %v815_v22 }
 0x32f   :  { %v979_v23 = vrot.slane %v965_v30, %v2359_v18  ;;  %v2216_v20 = vmov 842150450   ;;  %v2217_v28 = vmov 1414812756   ;;  %v2218_v61 = vmov 1987475062  }
 0x330   :  { %v955_v38 = vadd.f32 %v947_v31, %v816_v26  ;;  %v981_v39 = vcombine.low %v952_v32, %v953_v33  ;;  %v972_v24 = vrot.slane %v964_v35, %v2359_v18  ;;  %v1183_v26 = vunpack.c.l.s4 %v2216_v20 }
 0x331   :  { %v1197_v5 = vunpack.c.l.s4 %v2218_v61 }
 0x332   :  { %v982_v41 = vcombine.low %v954_v36, %v955_v38  ;;  %v989_v50 = vrot.slane %v981_v39, %v2359_v18  ;;  %v980_v29 = vcombine.low %v972_v24, %v979_v23  ;;  %v1184_v31 = vunpack.c.0.s8 %v1183_v26  ;;  %v2067_v26 = vld [vmem:[%s2815_s7] ss:$0 sm:$0xff] }
 0x333   :  { %v1198_v33 = vunpack.c.0.s8 %v1197_v5  ;;  %v1398_v5 = vrot.slane %v2067_v26, %v2359_v18 }
 0x334   :  { %v996_v42 = vrot.slane %v982_v41, %v2359_v18  ;;  %v2579_v36 = vsub.s32 %v1184_v31, %v2308_v6 }
 0x335   :  { %v2585_v39 = vsub.s32 %v1198_v33, %v2308_v6 }
 0x336   :  { %v997_v43 = vcombine.low %v989_v50, %v996_v42 }
 0x338   :  { %v1000_v44 = vpack.c.bf16 %v997_v43, %v980_v29 }
 0x33a   :  { %2146 = vmatmul.mubr.msk.bf16.vlgmr.msra.gmra.mxu1 %vm127_vm1, %v1000_v44 }
 0x33b   :  { %2165 = vmatprep.mubr.msk.bf16.mxu1 %vm2211_vm0, %v2210_v1 }
 0x3fa   :  { %v1061_v46 = vpop.f32.mrf.mxu1 }
 0x3fb   :  { %v1062_v48 = vadd.f32 %v2063_v45, %v1061_v46 }
 0x3fc   :  { %v2147_v49 = vpop.f32.mrf.mxu1 }
 0x3fd   :  { %v1070_v51 = vcombine.high %v1062_v48, %v1062_v48  ;;  %v1077_v52 = vrot.slane %v1062_v48, %v2359_v18 }
 0x3fe   :  { %v1064_v53 = vpop.f32.mrf.mxu1 }
 0x3ff   :  { %v1084_v54 = vrot.slane %v1070_v51, %v2359_v18  ;;  %v1085_v55 = vcombine.high %v1077_v52, %v1077_v52  ;;  %v1065_v56 = vadd.f32 %v2063_v45, %v1064_v53  ;;  %v1112_v60 = vadd.f32 %v1077_v52, %v2316_v7 }
 0x400   :  { %v2148_v57 = vpop.f32.mrf.mxu1 }
 0x401   :  { %v1086_v59 = vcombine.high %v1084_v54, %v1084_v54  ;;  %v1113_v62 = vadd.f32 %v1085_v55, %v2321_v8  ;;  %v1087_v63 = vcombine.high %v1065_v56, %v1065_v56  ;;  %v1094_v0 = vrot.slane %v1065_v56, %v2359_v18 }
 0x402   :  { %v1114_v2 = vadd.f32 %v1084_v54, %v2326_v9 }
 0x403   :  { %v1101_v3 = vrot.slane %v1087_v63, %v2359_v18  ;;  %v1115_v4 = vadd.f32 %v1086_v59, %v2332_v11  ;;  %v1128_v47 = vcombine.low %v1112_v60, %v1113_v62  ;;  %v1102_v40 = vcombine.high %v1094_v0, %v1094_v0 }
 0x404   :  { %v1116_v37 = vadd.f32 %v1094_v0, %v2337_v12 }
 0x405   :  { %v1103_v10 = vcombine.high %v1101_v3, %v1101_v3  ;;  %v1129_v14 = vcombine.low %v1114_v2, %v1115_v4  ;;  %v1117_v17 = vadd.f32 %v1102_v40, %v2342_v13  ;;  %v1118_v7 = vadd.f32 %v1101_v3, %v2349_v15 }
 0x406   :  { %v1136_v8 = vrot.slane %v1128_v47, %v2359_v18  ;;  %v2215_v15 = vmov 269488144  }
 0x407   :  { %v1143_v58 = vrot.slane %v1129_v14, %v2359_v18  ;;  %v1119_v9 = vadd.f32 %v1103_v10, %v2354_v16  ;;  %v1145_v19 = vcombine.low %v1116_v37, %v1117_v17  ;;  %v1176_v27 = vunpack.c.l.s4 %v2215_v15 }
 0x408   :  { %v1190_v16 = vunpack.c.l.s4 %v2217_v28  ;;  %v2068_v28 = vld [vmem:[%s2816_s8] ss:$0 sm:$0xff] }
 0x409   :  { %v1144_v34 = vcombine.low %v1136_v8, %v1143_v58  ;;  %v1146_v21 = vcombine.low %v1118_v7, %v1119_v9  ;;  %v1153_v22 = vrot.slane %v1145_v19, %v2359_v18  ;;  %v1177_v30 = vunpack.c.0.s8 %v1176_v27 }
 0x40a   :  { %v1191_v32 = vunpack.c.0.s8 %v1190_v16  ;;  %v1391_v16 = vcombine.high %v2067_v26, %v2067_v26  ;;  %v1426_v61 = vcombine.high %v2068_v28, %v2068_v28  ;;  %v2188_v26 = vld [vmem:[%s2814_s11 + $0x8] sm:$0xff]  }
 0x40b   :  { %v1164_v11 = vsel %vm127_vm1, %v1144_v34, 0.0  ;;  %v1160_v25 = vrot.slane %v1146_v21, %v2359_v18  ;;  %v2576_v35 = vsub.s32 %v1177_v30, %v2308_v6  ;;  %v2184_v21 = vld [vmem:[%s2813_s9 + $0x8] sm:$0xff]  }
 0x40c   :  { %1165 = vadd.xlane.f32.xlu0 %v1164_v11  ;;  %v2582_v38 = vsub.s32 %v1191_v32, %v2308_v6  ;;  %2150 = vmatpush3.bf16.msra.mxu0 %v2184_v21  ;;  %v2185_v11 = vld [vmem:[%s2813_s9] sm:$0xff]   ;;  %v1405_v30 = vrot.slane %v1391_v16, %v2359_v18  ;;  %v1433_v32 = vrot.slane %v2068_v28, %v2359_v18 }
 0x40d   :  { %v1161_v12 = vcombine.low %v1153_v22, %v1160_v25  ;;  %2151 = vmatprep.subr.bf16.mxu0 %v2210_v1  ;;  %v2186_v22 = vld [vmem:[%s2814_s11 + $0x18] sm:$0xff]   ;;  %v1440_v33 = vrot.slane %v1426_v61, %v2359_v18  ;;  %v2189_v28 = vld [vmem:[%s2814_s11] sm:$0xff]  }
 0x40e   :  { %2158 = vmatpush3.bf16.msra.mxu1 %v2186_v22  ;;  %v2069_v16 = vld [vmem:[%s2817_s10] ss:$0 sm:$0xff] }
 0x40f   :  { %v1167_v13 = vsel %vm127_vm1, %v1161_v12, 0.0  ;;  %2159 = vmatprep.subr.bf16.mxu1 %v2210_v1 }
 0x410   :  { %1168 = vadd.xlane.f32.xlu1 %v1167_v13  ;;  %2152 = vmatpush3.bf16.msra.mxu0 %v2185_v11 }
 0x495   :  { %v1166_v23 = vpop.xlane.xlu0 %1165 }
 0x496   :  { %v1171_v41 = vmul.f32 0.03125, %v1166_v23 }
 0x498   :  { %v1181_v24 = vrot.slane %v1171_v41, %v2576_v35  ;;  %v1188_v50 = vrot.slane %v1171_v41, %v2579_v36  ;;  %v1195_v42 = vrot.slane %v1171_v41, %v2582_v38  ;;  %v1202_v29 = vrot.slane %v1171_v41, %v2585_v39 }
 0x499   :  { %v1169_v43 = vpop.xlane.xlu1 %1168 }
 0x49a   :  { %v1172_v44 = vmul.f32 0.03125, %v1169_v43  ;;  %v2591_v45 = vsub.f32 %v1112_v60, %v1181_v24  ;;  %v2593_v46 = vsub.f32 %v1113_v62, %v1188_v50  ;;  %v2595_v48 = vsub.f32 %v1114_v2, %v1195_v42 }
 0x49b   :  { %v2597_v6 = vsub.f32 %v1115_v4, %v1202_v29  ;;  %v1406_v42 = vcombine.high %v1398_v5, %v1398_v5  ;;  %v1407_v29 = vcombine.high %v1405_v30, %v1405_v30 }
 0x49c   :  { %v1209_v49 = vrot.slane %v1172_v44, %v2576_v35  ;;  %v1216_v51 = vrot.slane %v1172_v44, %v2579_v36  ;;  %v1223_v52 = vrot.slane %v1172_v44, %v2582_v38  ;;  %v1230_v53 = vrot.slane %v1172_v44, %v2585_v39 }
 0x49d   :  { %v1247_v54 = vmul.f32 %v2591_v45, %v2591_v45  ;;  %v1248_v55 = vmul.f32 %v2593_v46, %v2593_v46  ;;  %v1249_v56 = vmul.f32 %v2595_v48, %v2595_v48  ;;  %v1250_v57 = vmul.f32 %v2597_v6, %v2597_v6 }
 0x49e   :  { %v2611_v59 = vsub.f32 %v1116_v37, %v1209_v49  ;;  %v2613_v60 = vsub.f32 %v1117_v17, %v1216_v51  ;;  %v2615_v62 = vsub.f32 %v1118_v7, %v1223_v52  ;;  %v2617_v63 = vsub.f32 %v1119_v9, %v1230_v53 }
 0x49f   :  { %v1263_v0 = vcombine.low %v1247_v54, %v1248_v55  ;;  %v1264_v2 = vcombine.low %v1249_v56, %v1250_v57  ;;  %v1441_v53 = vcombine.high %v1433_v32, %v1433_v32  ;;  %v1442_v54 = vcombine.high %v1440_v33, %v1440_v33 }
 0x4a0   :  { %v1251_v3 = vmul.f32 %v2611_v59, %v2611_v59  ;;  %v1252_v4 = vmul.f32 %v2613_v60, %v2613_v60  ;;  %v1253_v47 = vmul.f32 %v2615_v62, %v2615_v62  ;;  %v1254_v40 = vmul.f32 %v2617_v63, %v2617_v63 }
 0x4a1   :  { %v1271_v10 = vrot.slane %v1263_v0, %v2359_v18  ;;  %v1278_v14 = vrot.slane %v1264_v2, %v2359_v18 }
 0x4a2   :  { %v1280_v37 = vcombine.low %v1251_v3, %v1252_v4  ;;  %v1281_v17 = vcombine.low %v1253_v47, %v1254_v40 }
 0x4a3   :  { %v1279_v7 = vcombine.low %v1271_v10, %v1278_v14 }
 0x4a4   :  { %v1288_v8 = vrot.slane %v1280_v37, %v2359_v18  ;;  %v1295_v58 = vrot.slane %v1281_v17, %v2359_v18 }
 0x4a5   :  { %v1299_v9 = vsel %vm127_vm1, %v1279_v7, 0.0 }
 0x4a6   :  { %1300 = vadd.xlane.f32.xlu0 %v1299_v9  ;;  %v1296_v19 = vcombine.low %v1288_v8, %v1295_v58 }
 0x4a8   :  { %v1302_v34 = vsel %vm127_vm1, %v1296_v19, 0.0 }
 0x4aa   :  { %1303 = vadd.xlane.f32.xlu0 %v1302_v34 }
 0x52f   :  { %v1301_v25 = vpop.xlane.xlu0 %1300 }
 0x530   :  { %v1305_v12 = vmul.f32 0.03125, %v1301_v25 }
 0x532   :  { %v1307_v13 = vadd.f32 1e-05, %v1305_v12 }
 0x533   :  { %v1304_v15 = vpop.xlane.xlu0 %1303 }
 0x534   :  { %2202 = vrsqrt.f32 %v1307_v13  ;;  %v1306_v27 = vmul.f32 0.03125, %v1304_v15 }
 0x536   :  { %v1308_v20 = vadd.f32 1e-05, %v1306_v27 }
 0x538   :  { %2204 = vrsqrt.f32 %v1308_v20  ;;  %v2187_v20 = vld [vmem:[%s2814_s11 + $0x10] sm:$0xff]  }
 0x539   :  { %2160 = vmatpush3.bf16.msra.mxu1 %v2187_v20 }
 0x53a   :  { %2161 = vmatprep.subr.bf16.mxu1 %v2210_v1 }
 0x53d   :  { %2162 = vmatpush3.bf16.msra.mxu1 %v2188_v26 }
 0x53e   :  { %2163 = vmatprep.subr.bf16.mxu1 %v2210_v1  ;;  %v2073_v1 = vld [vmem:[%s2818_s12] ss:$0 sm:$0xff] }
 0x541   :  { %v2203_v31 = vpop.eup %2202  ;;  %2164 = vmatpush3.bf16.msra.mxu1 %v2189_v28 }
 0x542   :  { %v1319_v23 = vrot.slane %v2203_v31, %v2576_v35  ;;  %v1326_v41 = vrot.slane %v2203_v31, %v2579_v36  ;;  %v1333_v24 = vrot.slane %v2203_v31, %v2582_v38  ;;  %v1340_v50 = vrot.slane %v2203_v31, %v2585_v39 }
 0x544   :  { %v1377_v43 = vmul.f32 %v1319_v23, %v2591_v45  ;;  %v1378_v44 = vmul.f32 %v1326_v41, %v2593_v46  ;;  %v1379_v49 = vmul.f32 %v1333_v24, %v2595_v48  ;;  %v1380_v51 = vmul.f32 %v1340_v50, %v2597_v6 }
 0x545   :  { %v2205_v52 = vpop.eup %2204 }
 0x546   :  { %v1347_v55 = vrot.slane %v2205_v52, %v2576_v35  ;;  %v1354_v56 = vrot.slane %v2205_v52, %v2579_v36  ;;  %v1361_v57 = vrot.slane %v2205_v52, %v2582_v38  ;;  %v1368_v0 = vrot.slane %v2205_v52, %v2585_v39 }
 0x547   :  { %v1412_v2 = vmul.f32 %v1398_v5, %v1377_v43  ;;  %v1413_v3 = vmul.f32 %v1406_v42, %v1378_v44  ;;  %v1414_v45 = vmul.f32 %v1405_v30, %v1379_v49  ;;  %v1415_v4 = vmul.f32 %v1407_v29, %v1380_v51 }
 0x548   :  { %v1381_v46 = vmul.f32 %v1347_v55, %v2611_v59  ;;  %v1382_v48 = vmul.f32 %v1354_v56, %v2613_v60  ;;  %v1383_v6 = vmul.f32 %v1361_v57, %v2615_v62  ;;  %v1384_v47 = vmul.f32 %v1368_v0, %v2617_v63 }
 0x549   :  { %v1447_v40 = vadd.f32 %v1433_v32, %v1412_v2  ;;  %v1448_v10 = vadd.f32 %v1441_v53, %v1413_v3  ;;  %v1449_v14 = vadd.f32 %v1440_v33, %v1414_v45  ;;  %v1450_v37 = vadd.f32 %v1442_v54, %v1415_v4 }
 0x54a   :  { %v1416_v17 = vmul.f32 %v1398_v5, %v1381_v46  ;;  %v1417_v7 = vmul.f32 %v1406_v42, %v1382_v48  ;;  %v1418_v8 = vmul.f32 %v1405_v30, %v1383_v6  ;;  %v1419_v58 = vmul.f32 %v1407_v29, %v1384_v47 }
 0x54b   :  { %v1463_v9 = vcombine.low %v1447_v40, %v1448_v10  ;;  %v1464_v19 = vcombine.low %v1449_v14, %v1450_v37 }
 0x54c   :  { %v1451_v34 = vadd.f32 %v1433_v32, %v1416_v17  ;;  %v1452_v21 = vadd.f32 %v1441_v53, %v1417_v7  ;;  %v1453_v11 = vadd.f32 %v1440_v33, %v1418_v8  ;;  %v1454_v59 = vadd.f32 %v1442_v54, %v1419_v58 }
 0x54d   :  { %v1471_v60 = vrot.slane %v1463_v9, %v2359_v18  ;;  %v1478_v62 = vrot.slane %v1464_v19, %v2359_v18 }
 0x54e   :  { %v1480_v22 = vcombine.low %v1451_v34, %v1452_v21  ;;  %v1481_v63 = vcombine.low %v1453_v11, %v1454_v59 }
 0x54f   :  { %v1479_v13 = vcombine.low %v1471_v60, %v1478_v62 }
 0x550   :  { %v1488_v25 = vrot.slane %v1480_v22, %v2359_v18  ;;  %v1495_v12 = vrot.slane %v1481_v63, %v2359_v18 }
 0x552   :  { %v1496_v15 = vcombine.low %v1488_v25, %v1495_v12 }
 0x554   :  { %v1499_v27 = vpack.c.bf16 %v1496_v15, %v1479_v13 }
 0x556   :  { %2154 = vmatmul.mubr.msk.bf16.vlgmr.msra.gmra.mxu0 %vm127_vm1, %v1499_v27 }
 0x616   :  { %v1560_v61 = vpop.f32.mrf.mxu0 }
 0x617   :  { %v1561_v30 = vadd.f32 %v2069_v16, %v1560_v61 }
 0x618   :  { %v2155_v5 = vpop.f32.mrf.mxu0 }
 0x619   :  { %v1567_v23 = vmax.f32 %v1561_v30, 0.0 }
 0x61a   :  { %v1563_v31 = vpop.f32.mrf.mxu0 }
 0x61b   :  { %v1564_v32 = vadd.f32 %v2069_v16, %v1563_v31 }
 0x61c   :  { %v2156_v33 = vpop.f32.mrf.mxu0 }
 0x61d   :  { %v1568_v41 = vmax.f32 %v1564_v32, 0.0 }
 0x61f   :  { %v1569_v24 = vpack.c.bf16 %v1568_v41, %v1567_v23 }
 0x621   :  { %2166 = vmatmul.mubr.msk.bf16.vlgmr.msra.gmra.mxu1 %vm1609_vm4, %v1569_v24 }
 0x6e1   :  { %v1647_v50 = vpop.f32.mrf.mxu1 }
 0x6e2   :  { %v1648_v42 = vadd.f32 %v2073_v1, %v1647_v50 }
 0x6e3   :  { %v2167_v29 = vpop.f32.mrf.mxu1 }
 0x6e4   :  { %v1656_v43 = vcombine.high %v1648_v42, %v1648_v42  ;;  %v1663_v44 = vrot.slane %v1648_v42, %v2359_v18 }
 0x6e5   :  { %v1650_v49 = vpop.f32.mrf.mxu1 }
 0x6e6   :  { %v1670_v51 = vrot.slane %v1656_v43, %v2359_v18  ;;  %v1671_v52 = vcombine.high %v1663_v44, %v1663_v44  ;;  %v1651_v53 = vadd.f32 %v2073_v1, %v1650_v49  ;;  %v1698_v56 = vadd.f32 %v1663_v44, %v1447_v40 }
 0x6e7   :  { %v2168_v54 = vpop.f32.mrf.mxu1 }
 0x6e8   :  { %v1672_v55 = vcombine.high %v1670_v51, %v1670_v51  ;;  %v1699_v57 = vadd.f32 %v1671_v52, %v1448_v10  ;;  %v1673_v0 = vcombine.high %v1651_v53, %v1651_v53  ;;  %v1680_v2 = vrot.slane %v1651_v53, %v2359_v18 }
 0x6e9   :  { %v1700_v3 = vadd.f32 %v1670_v51, %v1449_v14 }
 0x6ea   :  { %v1687_v45 = vrot.slane %v1673_v0, %v2359_v18  ;;  %v1701_v4 = vadd.f32 %v1672_v55, %v1450_v37  ;;  %v1714_v46 = vcombine.low %v1698_v56, %v1699_v57  ;;  %v1688_v48 = vcombine.high %v1680_v2, %v1680_v2 }
 0x6eb   :  { %v1702_v17 = vadd.f32 %v1680_v2, %v1451_v34 }
 0x6ec   :  { %v1689_v6 = vcombine.high %v1687_v45, %v1687_v45  ;;  %v1715_v47 = vcombine.low %v1700_v3, %v1701_v4  ;;  %v1703_v7 = vadd.f32 %v1688_v48, %v1452_v21  ;;  %v1704_v8 = vadd.f32 %v1687_v45, %v1453_v11 }
 0x6ed   :  { %v1722_v58 = vrot.slane %v1714_v46, %v2359_v18 }
 0x6ee   :  { %v1729_v9 = vrot.slane %v1715_v47, %v2359_v18  ;;  %v1705_v40 = vadd.f32 %v1689_v6, %v1454_v59  ;;  %v1731_v10 = vcombine.low %v1702_v17, %v1703_v7 }
 0x6f0   :  { %v1730_v19 = vcombine.low %v1722_v58, %v1729_v9  ;;  %v1732_v60 = vcombine.low %v1704_v8, %v1705_v40  ;;  %v1739_v62 = vrot.slane %v1731_v10, %v2359_v18 }
 0x6f2   :  { %v1750_v14 = vsel %vm127_vm1, %v1730_v19, 0.0  ;;  %v1746_v37 = vrot.slane %v1732_v60, %v2359_v18 }
 0x6f3   :  { %1751 = vadd.xlane.f32.xlu1 %v1750_v14 }
 0x6f4   :  { %v1747_v22 = vcombine.low %v1739_v62, %v1746_v37 }
 0x6f6   :  { %v1753_v34 = vsel %vm127_vm1, %v1747_v22, 0.0 }
 0x6f7   :  { %1754 = vadd.xlane.f32.xlu0 %v1753_v34 }
 0x77c   :  { %v1752_v21 = vpop.xlane.xlu1 %1751 }
 0x77d   :  { %v1756_v11 = vmul.f32 0.03125, %v1752_v21 }
 0x77f   :  { %v1766_v63 = vrot.slane %v1756_v11, %v2576_v35  ;;  %v1773_v59 = vrot.slane %v1756_v11, %v2579_v36  ;;  %v1780_v25 = vrot.slane %v1756_v11, %v2582_v38  ;;  %v1787_v12 = vrot.slane %v1756_v11, %v2585_v39 }
 0x780   :  { %v1755_v13 = vpop.xlane.xlu0 %1754 }
 0x781   :  { %v1757_v15 = vmul.f32 0.03125, %v1755_v13  ;;  %v2706_v27 = vsub.f32 %v1698_v56, %v1766_v63  ;;  %v2708_v20 = vsub.f32 %v1699_v57, %v1773_v59  ;;  %v2710_v26 = vsub.f32 %v1700_v3, %v1780_v25 }
 0x782   :  { %v2712_v28 = vsub.f32 %v1701_v4, %v1787_v12 }
 0x783   :  { %v1794_v16 = vrot.slane %v1757_v15, %v2576_v35  ;;  %v1801_v61 = vrot.slane %v1757_v15, %v2579_v36  ;;  %v1808_v5 = vrot.slane %v1757_v15, %v2582_v38  ;;  %v1815_v30 = vrot.slane %v1757_v15, %v2585_v39 }
 0x784   :  { %v1832_v31 = vmul.f32 %v2706_v27, %v2706_v27  ;;  %v1833_v32 = vmul.f32 %v2708_v20, %v2708_v20  ;;  %v1834_v33 = vmul.f32 %v2710_v26, %v2710_v26  ;;  %v1835_v23 = vmul.f32 %v2712_v28, %v2712_v28 }
 0x785   :  { %v2726_v41 = vsub.f32 %v1702_v17, %v1794_v16  ;;  %v2728_v24 = vsub.f32 %v1703_v7, %v1801_v61  ;;  %v2730_v1 = vsub.f32 %v1704_v8, %v1808_v5  ;;  %v2732_v50 = vsub.f32 %v1705_v40, %v1815_v30  ;;  %v2079_v7 = vld [vmem:[%s2819_s13] ss:$0 sm:$0xff] }
 0x786   :  { %v1848_v42 = vcombine.low %v1832_v31, %v1833_v32  ;;  %v1849_v29 = vcombine.low %v1834_v33, %v1835_v23  ;;  %v2080_v8 = vld [vmem:[%s2820_s14] ss:$0 sm:$0xff]  ;;  %v1976_v58 = vcombine.high %v2079_v7, %v2079_v7  ;;  %v1983_v40 = vrot.slane %v2079_v7, %v2359_v18 }
 0x787   :  { %v1836_v43 = vmul.f32 %v2726_v41, %v2726_v41  ;;  %v1837_v44 = vmul.f32 %v2728_v24, %v2728_v24  ;;  %v1838_v49 = vmul.f32 %v2730_v1, %v2730_v1  ;;  %v1839_v51 = vmul.f32 %v2732_v50, %v2732_v50 }
 0x788   :  { %v1856_v52 = vrot.slane %v1848_v42, %v2359_v18  ;;  %v1863_v53 = vrot.slane %v1849_v29, %v2359_v18  ;;  %v2011_v9 = vcombine.high %v2080_v8, %v2080_v8  ;;  %v1990_v10 = vrot.slane %v1976_v58, %v2359_v18 }
 0x789   :  { %v1865_v54 = vcombine.low %v1836_v43, %v1837_v44  ;;  %v1866_v55 = vcombine.low %v1838_v49, %v1839_v51  ;;  %v2018_v19 = vrot.slane %v2080_v8, %v2359_v18  ;;  %v1991_v62 = vcombine.high %v1983_v40, %v1983_v40 }
 0x78a   :  { %v1864_v56 = vcombine.low %v1856_v52, %v1863_v53  ;;  %v2025_v60 = vrot.slane %v2011_v9, %v2359_v18  ;;  %v1992_v37 = vcombine.high %v1990_v10, %v1990_v10 }
 0x78b   :  { %v1873_v57 = vrot.slane %v1865_v54, %v2359_v18  ;;  %v1880_v0 = vrot.slane %v1866_v55, %v2359_v18  ;;  %v2026_v63 = vcombine.high %v2018_v19, %v2018_v19 }
 0x78c   :  { %v1884_v2 = vsel %vm127_vm1, %v1864_v56, 0.0  ;;  %v2027_v59 = vcombine.high %v2025_v60, %v2025_v60 }
 0x78d   :  { %1885 = vadd.xlane.f32.xlu1 %v1884_v2  ;;  %v1881_v3 = vcombine.low %v1873_v57, %v1880_v0 }
 0x78f   :  { %v1887_v45 = vsel %vm127_vm1, %v1881_v3, 0.0 }
 0x790   :  { %1888 = vadd.xlane.f32.xlu0 %v1887_v45 }
 0x816   :  { %v1886_v4 = vpop.xlane.xlu1 %1885 }
 0x817   :  { %v1890_v46 = vmul.f32 0.03125, %v1886_v4 }
 0x819   :  { %v1892_v48 = vadd.f32 1e-05, %v1890_v46  ;;  %v1889_v6 = vpop.xlane.xlu0 %1888 }
 0x81a   :  { %v1891_v47 = vmul.f32 0.03125, %v1889_v6 }
 0x81b   :  { %2206 = vrsqrt.f32 %v1892_v48 }
 0x81c   :  { %v1893_v17 = vadd.f32 1e-05, %v1891_v47 }
 0x81e   :  { %2208 = vrsqrt.f32 %v1893_v17 }
 0x828   :  { %v2207_v14 = vpop.eup %2206 }
 0x829   :  { %v1904_v22 = vrot.slane %v2207_v14, %v2576_v35  ;;  %v1911_v34 = vrot.slane %v2207_v14, %v2579_v36  ;;  %v1918_v21 = vrot.slane %v2207_v14, %v2582_v38  ;;  %v1925_v11 = vrot.slane %v2207_v14, %v2585_v39 }
 0x82b   :  { %v2209_v25 = vpop.eup %2208  ;;  %v1962_v12 = vmul.f32 %v1904_v22, %v2706_v27  ;;  %v1963_v13 = vmul.f32 %v1911_v34, %v2708_v20  ;;  %v1964_v18 = vmul.f32 %v1918_v21, %v2710_v26  ;;  %v1965_v15 = vmul.f32 %v1925_v11, %v2712_v28 }
 0x82c   :  { %v1932_v16 = vrot.slane %v2209_v25, %v2576_v35  ;;  %v1939_v61 = vrot.slane %v2209_v25, %v2579_v36  ;;  %v1946_v5 = vrot.slane %v2209_v25, %v2582_v38  ;;  %v1953_v30 = vrot.slane %v2209_v25, %v2585_v39 }
 0x82d   :  { %v1997_v31 = vmul.f32 %v1983_v40, %v1962_v12  ;;  %v1998_v32 = vmul.f32 %v1991_v62, %v1963_v13  ;;  %v1999_v33 = vmul.f32 %v1990_v10, %v1964_v18  ;;  %v2000_v23 = vmul.f32 %v1992_v37, %v1965_v15 }
 0x82e   :  { %v1966_v27 = vmul.f32 %v1932_v16, %v2726_v41  ;;  %v1967_v20 = vmul.f32 %v1939_v61, %v2728_v24  ;;  %v1968_v26 = vmul.f32 %v1946_v5, %v2730_v1  ;;  %v1969_v28 = vmul.f32 %v1953_v30, %v2732_v50 }
 0x82f   :  { %v2032_v42 = vadd.f32 %v2018_v19, %v1997_v31  ;;  %v2033_v35 = vadd.f32 %v2026_v63, %v1998_v32  ;;  %v2034_v29 = vadd.f32 %v2025_v60, %v1999_v33  ;;  %v2035_v36 = vadd.f32 %v2027_v59, %v2000_v23 }
 0x830   :  { %v2001_v43 = vmul.f32 %v1983_v40, %v1966_v27  ;;  %v2002_v38 = vmul.f32 %v1991_v62, %v1967_v20  ;;  %v2003_v44 = vmul.f32 %v1990_v10, %v1968_v26  ;;  %v2004_v39 = vmul.f32 %v1992_v37, %v1969_v28 }
 0x831   :  { %2041 = vst.msk [vmem:[%s2821_s15] sm:$0x3] %vm2040_vm5, %v2032_v42  ;;  %2042 = vst.msk [vmem:[%s2821_s15 + $0x2] sm:$0x3] %vm2040_vm5, %v2033_v35 }
 0x832   :  { %2043 = vst.msk [vmem:[%s2821_s15 + $0x4] sm:$0x3] %vm2040_vm5, %v2034_v29  ;;  %2044 = vst.msk [vmem:[%s2821_s15 + $0x6] sm:$0x3] %vm2040_vm5, %v2035_v36  ;;  %v2036_v41 = vadd.f32 %v2018_v19, %v2001_v43  ;;  %v2037_v24 = vadd.f32 %v2026_v63, %v2002_v38  ;;  %v2038_v1 = vadd.f32 %v2025_v60, %v2003_v44 }
 0x833   :  { %v2039_v50 = vadd.f32 %v2027_v59, %v2004_v39 }
 0x834   :  { %2045 = vst.msk [vmem:[%s2821_s15 + $0x8] sm:$0x3] %vm2040_vm5, %v2036_v41  ;;  %2046 = vst.msk [vmem:[%s2821_s15 + $0xa] sm:$0x3] %vm2040_vm5, %v2037_v24 }
 0x835   :  { %2047 = vst.msk [vmem:[%s2821_s15 + $0xc] sm:$0x3] %vm2040_vm5, %v2038_v1  ;;  %2048 = vst.msk [vmem:[%s2821_s15 + $0xe] sm:$0x3] %vm2040_vm5, %v2039_v50 }

</bundles_post_ra>
